<compile_context>
chip_gen: v5e
topology: v5e:2x2
jax: 0.10.0
libtpu: 0.0.40
codegen_flags: <defaults>
</compile_context>

<pallas_src>
import functools

import jax
import jax.numpy as jnp
from jax.experimental import pallas as pl
from jax.experimental.pallas import tpu as pltpu


def _ffn_kernel(x_ref, g_ref, b_ref, w1_ref, b1_ref, w2_ref, b2_ref, o_ref, *, eps):
    # (tile_rows, D) slab of inputs, promoted to f32 for the elementwise path.
    x = x_ref[...].astype(jnp.float32)

    # --- LayerNorm over the last dim (matches nn.LayerNorm(dim), eps=1e-5), f32 VPU ---
    mean = jnp.mean(x, axis=-1, keepdims=True)
    xc = x - mean
    var = jnp.mean(xc * xc, axis=-1, keepdims=True)
    xn = xc * jax.lax.rsqrt(var + eps)                     # rsqrt -> EUP slot
    xn = xn * g_ref[...].astype(jnp.float32) + b_ref[...].astype(jnp.float32)

    # --- Linear(dim -> hidden): bf16 operands on the MXU, f32 accumulation ---
    h = jnp.dot(xn.astype(jnp.bfloat16), w1_ref[...],
                preferred_element_type=jnp.float32)
    h = h + b1_ref[...].astype(jnp.float32)
    h = jnp.maximum(h, 0.0)                                # ReLU in f32 on the VPU

    # --- Linear(hidden -> dim): bf16 operands on the MXU, f32 accumulation ---
    y = jnp.dot(h.astype(jnp.bfloat16), w2_ref[...],
                preferred_element_type=jnp.float32)
    y = y + b2_ref[...].astype(jnp.float32)

    # --- residual add (f32) and lane-dense store ---
    o_ref[...] = (y + x).astype(o_ref.dtype)


def feed_forward(x, gamma, beta, w1, b1, w2, b2, *, eps=1e-5, tile_rows=256):
    """x: (B, S, D). Weights stored as (in, out) so the kernel computes xn @ w."""
    B, S, D = x.shape
    H = w1.shape[1]
    N = B * S

    x2 = x.reshape(N, D)

    # Clamp the tile for tiny inputs (still a multiple of 8 sublanes), then pad rows
    # up to a multiple of tile_rows; padded rows are cropped before returning.
    tile_rows = max(8, min(tile_rows, ((N + 7) // 8) * 8))
    n_tiles = pl.cdiv(N, tile_rows)
    N_pad = n_tiles * tile_rows
    if N_pad != N:
        x2 = jnp.pad(x2, ((0, N_pad - N), (0, 0)))

    # bf16 weights: native MXU input dtype, halves weight VMEM/HBM footprint.
    w1b = w1.astype(jnp.bfloat16)
    w2b = w2.astype(jnp.bfloat16)

    itemsize = jnp.dtype(x.dtype).itemsize
    # VMEM budget: double-buffered in/out activation tiles + bf16 weights (x2 pipeline
    # buffers) + small vectors + f32 intermediates, with generous headroom.
    bytes_io = 2 * 2 * tile_rows * D * itemsize
    bytes_w = 2 * 2 * (D * H + H * D)
    bytes_small = 2 * 4 * (2 * D + H + D)
    bytes_scratch = 4 * tile_rows * (H + 4 * D)
    vmem_limit = int(min(max(2 * (bytes_io + bytes_w + bytes_small + bytes_scratch)
                             + (4 << 20), 16 << 20), 64 << 20))

    cost = pl.CostEstimate(
        flops=4 * N_pad * D * H,                           # two matmuls
        transcendentals=N_pad,                             # rsqrt per row
        bytes_accessed=(2 * N_pad * D * itemsize           # x in + out
                        + 2 * (D * H + H * D)              # bf16 weights
                        + 4 * (2 * D + H + D)),            # gamma/beta/biases
    )

    out = pl.pallas_call(
        functools.partial(_ffn_kernel, eps=eps),
        out_shape=jax.ShapeDtypeStruct((N_pad, D), x.dtype),
        grid_spec=pltpu.PrefetchScalarGridSpec(
            num_scalar_prefetch=0,
            grid=(n_tiles,),
            in_specs=[
                pl.BlockSpec((tile_rows, D), lambda i: (i, 0)),   # x rows
                pl.BlockSpec((1, D), lambda i: (0, 0)),           # gamma (resident)
                pl.BlockSpec((1, D), lambda i: (0, 0)),           # beta  (resident)
                pl.BlockSpec((D, H), lambda i: (0, 0)),           # w1 bf16 (resident)
                pl.BlockSpec((1, H), lambda i: (0, 0)),           # b1
                pl.BlockSpec((H, D), lambda i: (0, 0)),           # w2 bf16 (resident)
                pl.BlockSpec((1, D), lambda i: (0, 0)),           # b2
            ],
            out_specs=pl.BlockSpec((tile_rows, D), lambda i: (i, 0)),
        ),
        compiler_params=pltpu.CompilerParams(
            dimension_semantics=("parallel",),
            vmem_limit_bytes=vmem_limit),
        cost_estimate=cost,
    )(x2, gamma, beta, w1b, b1, w2b, b2)

    if N_pad != N:
        out = out[:N]
    return out.reshape(B, S, D)


def _reference(x, gamma, beta, w1, b1, w2, b2, eps=1e-5):
    mean = jnp.mean(x, axis=-1, keepdims=True)
    var = jnp.mean((x - mean) ** 2, axis=-1, keepdims=True)
    xn = (x - mean) / jnp.sqrt(var + eps) * gamma[0] + beta[0]
    h = jnp.maximum(xn @ w1 + b1[0], 0.0)
    return h @ w2 + b2[0] + x


if __name__ == "__main__":
    # dim=128, hidden_dim=256 (lane-dense last dims), B*S=512 -> grid of 2 x 256-row tiles.
    B, S, D, Hd = 2, 256, 128, 256

    key = jax.random.PRNGKey(0)
    kx, k1, k2, k3, k4 = jax.random.split(key, 5)

    x = jax.random.normal(kx, (B, S, D), dtype=jnp.float32)

    # Deterministic parameter init (PyTorch-style uniform bounds, synthetic).
    gamma = jnp.ones((1, D), jnp.float32)
    beta = jnp.zeros((1, D), jnp.float32)
    bound1 = 1.0 / (D ** 0.5)
    bound2 = 1.0 / (Hd ** 0.5)
    w1 = jax.random.uniform(k1, (D, Hd), jnp.float32, -bound1, bound1)   # (in, out)
    b1 = jax.random.uniform(k2, (1, Hd), jnp.float32, -bound1, bound1)
    w2 = jax.random.uniform(k3, (Hd, D), jnp.float32, -bound2, bound2)
    b2 = jax.random.uniform(k4, (1, D), jnp.float32, -bound2, bound2)

    out = feed_forward(x, gamma, beta, w1, b1, w2, b2)
    out = jax.block_until_ready(out)

    ref = _reference(x, gamma, beta, w1, b1, w2, b2)
    assert out.shape == x.shape and out.dtype == x.dtype
    # Tolerance loosened slightly for bf16 MXU operands (f32 accumulation).
    assert jnp.allclose(out, ref, atol=3e-2, rtol=3e-2), "mismatch vs reference"

    print("KERNEL_OK")
</pallas_src>

<mosaic_0001>
module attributes {stable_mosaic.version = 11 : i64} {
  func.func @_ffn_kernel(%arg0: i32, %arg1: memref<256x128xf32, #tpu.memory_space<vmem>>, %arg2: memref<1x128xf32, #tpu.memory_space<vmem>>, %arg3: memref<1x128xf32, #tpu.memory_space<vmem>>, %arg4: memref<128x256xbf16, #tpu.memory_space<vmem>>, %arg5: memref<1x256xf32, #tpu.memory_space<vmem>>, %arg6: memref<256x128xbf16, #tpu.memory_space<vmem>>, %arg7: memref<1x128xf32, #tpu.memory_space<vmem>>, %arg8: memref<256x128xf32, #tpu.memory_space<vmem>>) attributes {dimension_semantics = [#tpu.dimension_semantics<parallel>], iteration_bounds = array<i64: 2>, scalar_prefetch = 0 : i64, scratch_operands = 0 : i64, tpu.core_type = #tpu.core_type<tc>, window_params = [{transform_indices = @transform_0, window_bounds = array<i64: 256, 128>}, {pipeline_mode = #tpu.pipeline_mode<synchronous>, transform_indices = @transform_1, window_bounds = array<i64: 1, 128>}, {pipeline_mode = #tpu.pipeline_mode<synchronous>, transform_indices = @transform_2, window_bounds = array<i64: 1, 128>}, {pipeline_mode = #tpu.pipeline_mode<synchronous>, transform_indices = @transform_3, window_bounds = array<i64: 128, 256>}, {pipeline_mode = #tpu.pipeline_mode<synchronous>, transform_indices = @transform_4, window_bounds = array<i64: 1, 256>}, {pipeline_mode = #tpu.pipeline_mode<synchronous>, transform_indices = @transform_5, window_bounds = array<i64: 256, 128>}, {pipeline_mode = #tpu.pipeline_mode<synchronous>, transform_indices = @transform_6, window_bounds = array<i64: 1, 128>}, {transform_indices = @transform_7, window_bounds = array<i64: 256, 128>}]} {
    %c0 = arith.constant 0 : index
    %c0_0 = arith.constant 0 : index
    %0 = vector.load %arg1[%c0, %c0_0] : memref<256x128xf32, #tpu.memory_space<vmem>>, vector<256x128xf32>
    %cst = arith.constant dense<0.000000e+00> : vector<256xf32>
    %1 = vector.multi_reduction <add>, %0, %cst [1] : vector<256x128xf32> to vector<256xf32>
    %2 = vector.shape_cast %1 : vector<256xf32> to vector<256x1xf32>
    %cst_1 = arith.constant 1.280000e+02 : f32
    %3 = vector.broadcast %cst_1 : f32 to vector<256x1xf32>
    %4 = arith.divf %2, %3 : vector<256x1xf32>
    %5 = vector.broadcast %4 : vector<256x1xf32> to vector<256x128xf32>
    %6 = arith.subf %0, %5 : vector<256x128xf32>
    %7 = arith.mulf %6, %6 : vector<256x128xf32>
    %cst_2 = arith.constant dense<0.000000e+00> : vector<256xf32>
    %8 = vector.multi_reduction <add>, %7, %cst_2 [1] : vector<256x128xf32> to vector<256xf32>
    %9 = vector.shape_cast %8 : vector<256xf32> to vector<256x1xf32>
    %cst_3 = arith.constant 1.280000e+02 : f32
    %10 = vector.broadcast %cst_3 : f32 to vector<256x1xf32>
    %11 = arith.divf %9, %10 : vector<256x1xf32>
    %cst_4 = arith.constant 9.99999974E-6 : f32
    %12 = vector.broadcast %cst_4 : f32 to vector<256x1xf32>
    %13 = arith.addf %11, %12 : vector<256x1xf32>
    %14 = math.rsqrt %13 : vector<256x1xf32>
    %15 = vector.broadcast %14 : vector<256x1xf32> to vector<256x128xf32>
    %16 = arith.mulf %6, %15 : vector<256x128xf32>
    %c0_5 = arith.constant 0 : index
    %c0_6 = arith.constant 0 : index
    %17 = vector.load %arg2[%c0_5, %c0_6] : memref<1x128xf32, #tpu.memory_space<vmem>>, vector<1x128xf32>
    %18 = vector.broadcast %17 : vector<1x128xf32> to vector<256x128xf32>
    %19 = arith.mulf %16, %18 : vector<256x128xf32>
    %c0_7 = arith.constant 0 : index
    %c0_8 = arith.constant 0 : index
    %20 = vector.load %arg3[%c0_7, %c0_8] : memref<1x128xf32, #tpu.memory_space<vmem>>, vector<1x128xf32>
    %21 = vector.broadcast %20 : vector<1x128xf32> to vector<256x128xf32>
    %22 = arith.addf %19, %21 : vector<256x128xf32>
    %23 = arith.truncf %22 : vector<256x128xf32> to vector<256x128xbf16>
    %c0_9 = arith.constant 0 : index
    %c0_10 = arith.constant 0 : index
    %24 = vector.load %arg4[%c0_9, %c0_10] : memref<128x256xbf16, #tpu.memory_space<vmem>>, vector<128x256xbf16>
    %cst_11 = arith.constant dense<0.000000e+00> : vector<256x256xf32>
    %25 = tpu.matmul %23, %24, %cst_11 {dimension_numbers = #tpu.dot_dimension_numbers<[1], [0], [0], [1], [0, 0, 1, 1], [], []>} : vector<256x128xbf16>, vector<128x256xbf16>, vector<256x256xf32> -> vector<256x256xf32>
    %c0_12 = arith.constant 0 : index
    %c0_13 = arith.constant 0 : index
    %26 = vector.load %arg5[%c0_12, %c0_13] : memref<1x256xf32, #tpu.memory_space<vmem>>, vector<1x256xf32>
    %27 = vector.broadcast %26 : vector<1x256xf32> to vector<256x256xf32>
    %28 = arith.addf %25, %27 : vector<256x256xf32>
    %cst_14 = arith.constant 0.000000e+00 : f32
    %29 = vector.broadcast %cst_14 : f32 to vector<256x256xf32>
    %30 = arith.maximumf %28, %29 : vector<256x256xf32>
    %31 = arith.truncf %30 : vector<256x256xf32> to vector<256x256xbf16>
    %c0_15 = arith.constant 0 : index
    %c0_16 = arith.constant 0 : index
    %32 = vector.load %arg6[%c0_15, %c0_16] : memref<256x128xbf16, #tpu.memory_space<vmem>>, vector<256x128xbf16>
    %cst_17 = arith.constant dense<0.000000e+00> : vector<256x128xf32>
    %33 = tpu.matmul %31, %32, %cst_17 {dimension_numbers = #tpu.dot_dimension_numbers<[1], [0], [0], [1], [0, 0, 1, 1], [], []>} : vector<256x256xbf16>, vector<256x128xbf16>, vector<256x128xf32> -> vector<256x128xf32>
    %c0_18 = arith.constant 0 : index
    %c0_19 = arith.constant 0 : index
    %34 = vector.load %arg7[%c0_18, %c0_19] : memref<1x128xf32, #tpu.memory_space<vmem>>, vector<1x128xf32>
    %35 = vector.broadcast %34 : vector<1x128xf32> to vector<256x128xf32>
    %36 = arith.addf %33, %35 : vector<256x128xf32>
    %37 = arith.addf %36, %0 : vector<256x128xf32>
    %c0_20 = arith.constant 0 : index
    %c0_21 = arith.constant 0 : index
    %38 = vector.load %arg8[%c0_20, %c0_21] : memref<256x128xf32, #tpu.memory_space<vmem>>, vector<256x128xf32>
    tpu.vector_store %arg8[%c0_20, %c0_21], %37 {strides = array<i32>} : memref<256x128xf32, #tpu.memory_space<vmem>>, vector<256x128xf32>,
    return
  }
  func.func @transform_0(%arg0: i32) -> (i32, i32) {
    %c0_i32 = arith.constant 0 : i32
    %c0_i32_0 = arith.constant 0 : i32
    return %arg0, %c0_i32 : i32, i32
  }
  func.func @transform_1(%arg0: i32) -> (i32, i32) {
    %c0_i32 = arith.constant 0 : i32
    %c0_i32_0 = arith.constant 0 : i32
    %c0_i32_1 = arith.constant 0 : i32
    return %c0_i32, %c0_i32_0 : i32, i32
  }
  func.func @transform_2(%arg0: i32) -> (i32, i32) {
    %c0_i32 = arith.constant 0 : i32
    %c0_i32_0 = arith.constant 0 : i32
    %c0_i32_1 = arith.constant 0 : i32
    return %c0_i32, %c0_i32_0 : i32, i32
  }
  func.func @transform_3(%arg0: i32) -> (i32, i32) {
    %c0_i32 = arith.constant 0 : i32
    %c0_i32_0 = arith.constant 0 : i32
    %c0_i32_1 = arith.constant 0 : i32
    return %c0_i32, %c0_i32_0 : i32, i32
  }
  func.func @transform_4(%arg0: i32) -> (i32, i32) {
    %c0_i32 = arith.constant 0 : i32
    %c0_i32_0 = arith.constant 0 : i32
    %c0_i32_1 = arith.constant 0 : i32
    return %c0_i32, %c0_i32_0 : i32, i32
  }
  func.func @transform_5(%arg0: i32) -> (i32, i32) {
    %c0_i32 = arith.constant 0 : i32
    %c0_i32_0 = arith.constant 0 : i32
    %c0_i32_1 = arith.constant 0 : i32
    return %c0_i32, %c0_i32_0 : i32, i32
  }
  func.func @transform_6(%arg0: i32) -> (i32, i32) {
    %c0_i32 = arith.constant 0 : i32
    %c0_i32_0 = arith.constant 0 : i32
    %c0_i32_1 = arith.constant 0 : i32
    return %c0_i32, %c0_i32_0 : i32, i32
  }
  func.func @transform_7(%arg0: i32) -> (i32, i32) {
    %c0_i32 = arith.constant 0 : i32
    %c0_i32_0 = arith.constant 0 : i32
    return %arg0, %c0_i32 : i32, i32
  }
}

</mosaic_0001>

<bundles_post_ra>
// kernel: tpu_custom_call.1
= control target key start
LH: loop header
LB: loop body
LE: loop exit
PB: predicated region body
PF: predicated region fallthrough
CT: control target
= control target key end

     0   :  { %s3834_s0 = inlined_call_operand.hbm [shape: f32[512,128], index: 0, kind: input, shape index: {}]   ;;  %s3835_s1 = inlined_call_operand.hbm [shape: f32[1,128], index: 1, kind: input, shape index: {}]   ;;  %s3836_s2 = inlined_call_operand.vmem [shape: f32[1,128], index: 2, kind: input, shape index: {}]   ;;  %s3837_s3 = inlined_call_operand.hbm [shape: bf16[128,256], index: 3, kind: input, shape index: {}]   ;;  %s3838_s4 = inlined_call_operand.vmem [shape: f32[1,256], index: 4, kind: input, shape index: {}]   ;;  %s3839_s5 = inlined_call_operand.hbm [shape: bf16[256,128], index: 5, kind: input, shape index: {}]   ;;  %s3840_s6 = inlined_call_operand.vmem [shape: f32[1,128], index: 6, kind: input, shape index: {}]   ;;  %s3841_s7 = inlined_call_operand.hbm [shape: f32[512,128], index: 7, kind: output, shape index: {}]  }
   0x1   :  { %3844 = sst [smem:[#allocation15_spill]] %s3835_s1 }
   0x2   :  { %12 = vsyncpa [#allocation3], 0 }
   0x3   :  { %14 = vsyncpa [#allocation3 + $0x1], 0 }
   0x4   :  { %15 = vsyncpa [#allocation6], 0 }
   0x5   :  { %16 = vsyncpa [#allocation9], 0 }
   0x6   :  { %17 = vsyncpa [#allocation4], 0 }
   0x7   :  { %19 = vsyncpa [#allocation4 + $0x1], 0  ;;  %s2600_s24 = smov 0   ;;  %s2602_s25 = smov 0  }
   0x8   :  { %s2604_s26 = smov 0   ;;  %s2606_s27 = smov 0  }
   0x9 LB: > { %s2621_s28 = sadd.s32 4294967295, %s2548_s27   ;;  %s1984_s29 = sadd.s32 4294967294, %s2548_s27   ;;  %s2548_s27 = sphi %s2606_s27, %s3904_s27   ;;  %s2544_s26 = sphi %s2604_s26, %s3903_s26   ;;  %s2540_s25 = sphi %s2602_s25, %s3902_s25   ;;  %s2536_s24 = sphi %s2600_s24, %s3901_s24  }
   0xa   : > { %p45_p0 = scmp.ne.s32.totalorder %s2540_s25, %s2536_s24  ;;  %p46_p1 = scmp.eq.s32.totalorder %s2621_s28, 0 }
   0xb   : > { %p195_p2 = scmp.eq.s32.totalorder %s2621_s28, 1  ;;  %p201_p3 = scmp.eq.s32.totalorder %s1984_s29, 1 }
   0xc   : > { %p2630_p4 = por %p46_p1, %p45_p0  ;;  %p1985_p5 = scmp.ge.s32.totalorder %s2548_s27, 1 }
   0xd   : > { %p2635_p6 = por %p201_p3, %p45_p0  ;;  %p208_p7 = scmp.lt.s32.totalorder %s2548_s27, 3 }
   0xe   : > { %s3847_s1 = sld [smem:[#allocation15_spill]]  ;;  %s2550_s13 = smov [#allocation5]  }
   0xf   : > { %p2643_p8 = pnand %p1985_p5, %p208_p7  ;;  %s222_s14 = sshll.u32 %s2550_s13, 4  ;;  %s223_s14 = int_to_ptr.vmem [resolvable:$true] %s222_s14 }
  0x10   : > { %s234_s17 = sshll.u32 %s3837_s3, 4  ;;  %s2551_s19 = smov [#allocation7]   ;;  %s235_s17 = int_to_ptr.hbm [resolvable:$true] %s234_s17 }
  0x11   : > { %p2182_p10 = pneg %p2643_p8  ;;  %s236_s20 = sshll.u32 %s2551_s19, 4  ;;  %s237_s20 = int_to_ptr.vmem [resolvable:$true] %s236_s20 }
  0x12   : > { %s3842_s21 = smov 128   ;;  %s3843_s22 = smov 8  }
  0x13   : > { %p2655_p11 = pnand %p2182_p10, %p46_p1  ;;  %s251_s9 = sshll.u32 %s3839_s5, 4  ;;  %s252_s9 = int_to_ptr.hbm [resolvable:$true] %s251_s9 }
  0x14   : > { %s220_s11 = sshll.u32 %s3847_s1, 4  ;;  %s2554_s10 = smov [#allocation8]   ;;  %s221_s11 = int_to_ptr.hbm [resolvable:$true] %s220_s11 }
  0x15   : > { %2185 = dma.hbm_to_vmem [thread:$0]  (!%p2655_p11), %s221_s11, 16, %s223_s14, [#allocation6]  }
  0x16   : > { %2188 = dma.hbm_to_vmem [thread:$0]  (!%p2655_p11), %s235_s17, 2048, %s237_s20, [#allocation6], %s3842_s21, %s3842_s21, %s3843_s22  }
  0x17   : > { %s253_s11 = sshll.u32 %s2554_s10, 4  ;;  %s2555_s13 = smov 64   ;;  %s254_s11 = int_to_ptr.vmem [resolvable:$true] %s253_s11 }
  0x18   : > { %s2556_s14 = smov 4   ;;  %s2672_s15 = sadd.s32 1, %s2548_s27  }
  0x19   : > { %2191 = dma.hbm_to_vmem [thread:$0]  (!%p2655_p11), %s252_s9, 2048, %s254_s11, [#allocation9], %s2555_s13, %s2555_s13, %s2556_s14  }
  0x1a   : > { %s29_s16 = ssub.s32 %s2548_s27, %s2672_s15  ;;  %s32_s17 = sadd.s32 1, %s2544_s26 }
  0x1b   : > { %p30_p12 = scmp.eq.s32.totalorder %s29_s16, 0  ;;  %p39_p13 = scmp.ne.s32.totalorder %s2544_s26, %s2540_s25 }
  0x1c   : > { %p40_p0 = scmp.eq.s32.totalorder %s2548_s27, 0  ;;  %p2203_p5 = scmp.lt.s32.totalorder %s2548_s27, 2 }
  0x1d   : > { %s2681_s19 = scalar_select %p30_p12, %s2544_s26, %s32_s17  }
  0x1e   : > { %p2685_p3 = por %p195_p2, %p39_p13  ;;  %s270_s23 = sand.u32 1, %s2544_s26  }
  0x1f   : > { %s2132_s29 = sshll.u32 %s2548_s27, 8  ;;  %p41_p7 = por %p40_p0, %p39_p13 }
  0x20   : > { %s1990_s18 = sshll.u32 %s270_s23, 8  ;;  %s279_s11 = scalar_lea.hbm %s3834_s0, %s2132_s29 }
  0x21   : > { %s280_s13 = sshll.u32 %s279_s11, 4  ;;  %s274_s14 = scalar_lea.vmem [#allocation2], %s1990_s18  ;;  %s281_s13 = int_to_ptr.hbm [resolvable:$true] %s280_s13 }
  0x22   : > { %s282_s16 = sshll.u32 %s274_s14, 4  ;;  %p2695_p10 = pnand %p2203_p5, %p41_p7  ;;  %s283_s16 = int_to_ptr.vmem [resolvable:$true] %s282_s16 }
  0x23   : > { %s271_s21 = scalar_lea.sflag [#allocation3], %s270_s23  ;;  %s2444_s22 = sshra.s32 %s281_s13, 4  ;;  %s2445_s22 = int_to_ptr.hbm [resolvable:$true] %s2444_s22 }
  0x24   : > { %s2446_s1 = scalar_lea.hbm %s2445_s22, 256  ;;  %p2448_p11 = pneg %p2695_p10 }
  0x25   : > { %p2447_p2 = scmp.ne.s32.totalorder %s2445_s22, %s2446_s1  ;;  %s2451_s18 = scalar_lea.hbm %s3834_s0, 512 }
  0x26   : > { %p2452_p0 = scmp.lt.s32.totalorder %s2445_s22, %s3834_s0  ;;  %p2453_p5 = scmp.lt.s32.totalorder %s2451_s18, %s2446_s1 }
  0x27   : > { %p2449_p12 = pnand %p2448_p11, %p2447_p2 }
  0x28   : > { %p2454_p7 = por %p2453_p5, %p2452_p0 }
  0x29   : > { %p2450_p13 = pneg %p2449_p12 }
  0x2b   : > { %p2455_p9 = pnand %p2454_p7, %p2450_p13 }
  0x2d   : > { %2458 = shalt.err (!%p2455_p9)
}
  0x2e   : > { %s3852_s23 = smov 8   ;;  %s3853_s14 = smov 128  }
  0x2f   : > { %2195 = dma.hbm_to_vmem [thread:$0]  (!%p2695_p10), %s281_s13, 4096, %s283_s16, %s271_s21, %s3853_s14, %s3853_s14, %s3852_s23  }
  0x30   : > { %294 = sbr.rel (%p2643_p8) target bundleno = 1161 (0x489), region = 48  ;;  %s2715_s29 = sand.u32 (!%p2643_p8), 1, %s2540_s25  }
  0x31   : > { %s1994_s1 = sshll.u32 (!%p2643_p8), %s2715_s29, 8  ;;  %s297_s22 = scalar_lea.sflag (!%p2643_p8), [#allocation3], %s2715_s29 }
  0x32   : > { %s2721_s9 = scalar_lea.vmem (!%p2643_p8), [#allocation2], %s1994_s1 }
  0x35   : > { %2519 = dma.done.wait (%p2630_p4), %s297_s22, 4096  }
  0x36   : > { %2521 = vsyncadd (%p2630_p4), %s297_s22, 4294963200 }
  0x37   : > { %2523 = dma.done.wait (%p46_p1), [#allocation6], 2064  }
  0x38   : > { %2525 = vsyncadd (%p46_p1), [#allocation6], 4294965232 }
  0x39   : > { %2527 = dma.done.wait (%p46_p1), [#allocation9], 2048  }
  0x3a   : > { %2529 = vsyncadd (%p46_p1), [#allocation9], 4294965248  ;;  %v351_v0 = vld [vmem:[%s2721_s9 + $0x10] sm:$0xff]  ;;  %v349_v1 = vld [vmem:[%s2721_s9] sm:$0xff]  ;;  %v2557_v7 = vmov 128.0   ;;  %s3463_s11 = scalar_lea.vmem [#allocation10], %s1994_s1 }
  0x3b   : > { %385 = vadd.xlane.f32.xlu1 %v351_v0  ;;  %381 = vadd.xlane.f32.xlu0 %v349_v1  ;;  %v353_v2 = vld [vmem:[%s2721_s9 + $0x20] sm:$0xff]  ;;  %v352_v3 = vld [vmem:[%s2721_s9 + $0x18] sm:$0xff]  ;;  %v350_v4 = vld [vmem:[%s2721_s9 + $0x8] sm:$0xff]  ;;  %2253 = vrcp.f32 %v2557_v7  ;;  %s2165_s1 = sshll.u32 %s2621_s28, 8  ;;  %s1879_s21 = sshll.u32 %s3463_s11, 4  ;;  %s1880_s21 = int_to_ptr.vmem [resolvable:$true] %s1879_s21 }
  0x3c   : > { %389 = vadd.xlane.f32.xlu2 %v353_v2  ;;  %v354_v5 = vld [vmem:[%s2721_s9 + $0x28] sm:$0xff]  ;;  %v355_v6 = vld [vmem:[%s2721_s9 + $0x30] sm:$0xff]  ;;  %v2758_v28 = vld [vmem:[%s2721_s9 + $0x38] sm:$0xff]  ;;  %s1878_s12 = scalar_lea.hbm %s3841_s7, %s2165_s1  ;;  %s1867_s28 = scalar_lea.sflag [#allocation4], %s2715_s29 }
  0x3d   : > { %v2773_v36 = vld [vmem:[%s2721_s9 + $0x40] sm:$0xff]  ;;  %v2784_v42 = vld [vmem:[%s2721_s9 + $0x58] sm:$0xff]  ;;  %v2787_v43 = vld [vmem:[%s2721_s9 + $0x48] sm:$0xff]  ;;  %s1881_s13 = sshll.u32 %s1878_s12, 4  ;;  %s2494_s23 = scalar_lea.hbm %s3841_s7, 512  ;;  %s1882_s13 = int_to_ptr.hbm [resolvable:$true] %s1881_s13 }
  0x3e   : > { %v2796_v46 = vld [vmem:[%s2721_s9 + $0x60] sm:$0xff]  ;;  %v2799_v47 = vld [vmem:[%s2721_s9 + $0x50] sm:$0xff]  ;;  %v2804_v48 = vld [vmem:[%s2721_s9 + $0x68] sm:$0xff]  ;;  %s2488_s16 = sshra.s32 %s1882_s13, 4  ;;  %s2489_s16 = int_to_ptr.hbm [resolvable:$true] %s2488_s16 }
  0x3f   : > { %v2808_v49 = vld [vmem:[%s2721_s9 + $0x70] sm:$0xff]  ;;  %v2148_v51 = vld [vmem:[#allocation7 + $0x74] sm:$0xf0]  ;;  %v2059_v54 = vld [vmem:[#allocation7 + $0x78] sm:$0xf0]  ;;  %s2490_s17 = scalar_lea.hbm %s2489_s16, 256  ;;  %p2495_p9 = scmp.lt.s32.totalorder %s2489_s16, %s3841_s7 }
  0x40   : > { %v2057_v50 = vld [vmem:[#allocation7 + $0x70] sm:$0xf]  ;;  %v2147_v52 = vld [vmem:[#allocation7 + $0x74] sm:$0xf]  ;;  %v2049_v56 = vld [vmem:[#allocation7 + $0x60] sm:$0xf]  ;;  %p2491_p1 = scmp.ne.s32.totalorder %s2489_s16, %s2490_s17  ;;  %p2496_p10 = scmp.lt.s32.totalorder %s2494_s23, %s2490_s17 }
  0x41   : > { %v2254_v8 = vpop.eup %2253  ;;  %v2058_v53 = vor.u32 %v2148_v51, %v2057_v50  ;;  %v2062_v55 = vor.u32 %v2147_v52, %v2059_v54  ;;  %v2146_v57 = vld [vmem:[#allocation7 + $0x64] sm:$0xf0]  ;;  %v2145_v58 = vld [vmem:[#allocation7 + $0x64] sm:$0xf]  ;;  %v2051_v60 = vld [vmem:[#allocation7 + $0x68] sm:$0xf0] }
  0x42   : > { %v446_v9 = vmul.f32 128.0, %v2254_v8  ;;  %vm450_vm0 = vweird.f32 %v2254_v8  ;;  %v2050_v59 = vor.u32 %v2146_v57, %v2049_v56  ;;  %v2054_v61 = vor.u32 %v2145_v58, %v2051_v60  ;;  %v2041_v62 = vld [vmem:[#allocation7 + $0x50] sm:$0xf]  ;;  %v2144_v63 = vld [vmem:[#allocation7 + $0x54] sm:$0xf0]  ;;  %p2492_p4 = pnand %p2491_p1, %p2685_p3  ;;  %p2497_p2 = por %p2496_p10, %p2495_p9 }
  0x43   : > { %387 = vadd.xlane.f32.xlu1 %v352_v3  ;;  %383 = vadd.xlane.f32.xlu0 %v350_v4  ;;  %v2133_v50 = vld [vmem:[#allocation7 + $0x4] sm:$0xf]  ;;  %v2003_v51 = vld [vmem:[#allocation7 + $0x8] sm:$0xf0] }
  0x44   : > { %391 = vadd.xlane.f32.xlu2 %v354_v5  ;;  %v447_v10 = vsub.f32 1.0, %v446_v9  ;;  %1218 = vmatpush.bf16.msra.mxu0 %v2058_v53  ;;  %v2006_v52 = vor.u32 %v2133_v50, %v2003_v51  ;;  %p2493_p8 = pneg %p2492_p4 }
  0x45   : > { %1307 = vmatpush.bf16.msra.mxu1 %v2062_v55 }
  0x46   : > { %v448_v11 = vmul.f32 %v2254_v8, %v447_v10  ;;  %v2025_v10 = vld [vmem:[#allocation7 + $0x30] sm:$0xf]  ;;  %p2498_p11 = pnand %p2497_p2, %p2493_p8 }
  0x48   : > { %v449_v12 = vadd.f32 %v2254_v8, %v448_v11  ;;  %1219 = vmatpush.bf16.msra.mxu0 %v2050_v59  ;;  %v2140_v11 = vld [vmem:[#allocation7 + $0x34] sm:$0xf0] }
  0x49   : > { %1308 = vmatpush.bf16.msra.mxu1 %v2054_v61 }
  0x4a   : > { %v2742_v13 = vsel %vm450_vm0, %v2254_v8, %v449_v12  ;;  %v2035_v8 = vld [vmem:[#allocation7 + $0x48] sm:$0xf0]  ;;  %v2139_v12 = vld [vmem:[#allocation7 + $0x34] sm:$0xf] }
  0x4c   : > { %393 = vadd.xlane.f32.xlu2 %v355_v6 }
  0xae   : > { %v386_v14 = vpop.xlane.xlu1 %385  ;;  %v382_v15 = vpop.xlane.xlu0 %381 }
  0xaf   : > { %v452_v16 = vmul.f32 %v2742_v13, %v382_v15  ;;  %v390_v18 = vpop.xlane.xlu2 %389  ;;  %v454_v27 = vmul.f32 %v2742_v13, %v386_v14  ;;  %v2026_v14 = vor.u32 %v2140_v11, %v2025_v10  ;;  %v2027_v15 = vld [vmem:[#allocation7 + $0x38] sm:$0xf0] }
  0xb0   : > { %v456_v26 = vmul.f32 %v2742_v13, %v390_v18  ;;  %v2017_v18 = vld [vmem:[#allocation7 + $0x20] sm:$0xf] }
  0xb1   : > { %v2745_v17 = vsub.f32 %v349_v1, %v452_v16  ;;  %v2767_v33 = vsub.f32 %v351_v0, %v454_v27  ;;  %v2143_v0 = vld [vmem:[#allocation7 + $0x54] sm:$0xf]  ;;  %v2042_v1 = vor.u32 %v2144_v63, %v2041_v62  ;;  %v2030_v16 = vor.u32 %v2139_v12, %v2027_v15  ;;  %v2136_v27 = vld [vmem:[#allocation7 + $0x14] sm:$0xf0] }
  0xb2   : > { %v2765_v32 = vsub.f32 %v353_v2, %v456_v26  ;;  %v2043_v2 = vld [vmem:[#allocation7 + $0x58] sm:$0xf0]  ;;  %v2009_v26 = vld [vmem:[#allocation7 + $0x10] sm:$0xf] }
  0xb3   : > { %v516_v19 = vmul.f32 %v2745_v17, %v2745_v17  ;;  %v518_v37 = vmul.f32 %v2767_v33, %v2767_v33  ;;  %1220 = vmatpush.bf16.msra.mxu0 %v2042_v1 }
  0xb4   : > { %v520_v34 = vmul.f32 %v2765_v32, %v2765_v32 }
  0xb5   : > { %548 = vadd.xlane.f32.xlu0 %v516_v19  ;;  %v2138_v19 = vld [vmem:[#allocation7 + $0x24] sm:$0xf0] }
  0xb6   : > { %v388_v20 = vpop.xlane.xlu1 %387  ;;  %v384_v21 = vpop.xlane.xlu0 %383 }
  0xb7   : > { %v455_v22 = vmul.f32 %v2742_v13, %v388_v20  ;;  %v453_v23 = vmul.f32 %v2742_v13, %v384_v21  ;;  %v392_v31 = vpop.xlane.xlu2 %391  ;;  %v2137_v20 = vld [vmem:[#allocation7 + $0x24] sm:$0xf]  ;;  %v2018_v21 = vor.u32 %v2138_v19, %v2017_v18 }
  0xb8   : > { %v457_v35 = vmul.f32 %v2742_v13, %v392_v31  ;;  %v2135_v31 = vld [vmem:[#allocation7 + $0x14] sm:$0xf] }
  0xb9   : > { %v2751_v24 = vsub.f32 %v352_v3, %v455_v22  ;;  %v2753_v25 = vsub.f32 %v350_v4, %v453_v23  ;;  %v2046_v3 = vor.u32 %v2143_v0, %v2043_v2  ;;  %v2033_v4 = vld [vmem:[#allocation7 + $0x40] sm:$0xf]  ;;  %v2019_v22 = vld [vmem:[#allocation7 + $0x28] sm:$0xf0] }
  0xba   : > { %v2778_v38 = vsub.f32 %v354_v5, %v457_v35  ;;  %v2142_v5 = vld [vmem:[#allocation7 + $0x44] sm:$0xf0]  ;;  %v2022_v23 = vor.u32 %v2137_v20, %v2019_v22 }
  0xbb   : > { %v519_v29 = vmul.f32 %v2751_v24, %v2751_v24  ;;  %v517_v30 = vmul.f32 %v2753_v25, %v2753_v25  ;;  %1309 = vmatpush.bf16.msra.mxu1 %v2046_v3  ;;  %v2034_v7 = vor.u32 %v2142_v5, %v2033_v4 }
  0xbc   : > { %v521_v40 = vmul.f32 %v2778_v38, %v2778_v38 }
  0xbd   : > { %554 = vadd.xlane.f32.xlu2 %v519_v29  ;;  %395 = vadd.xlane.f32.xlu0 %v2758_v28 }
  0xbe   : > { %550 = vadd.xlane.f32.xlu1 %v517_v30  ;;  %1221 = vmatpush.bf16.msra.mxu0 %v2034_v7  ;;  %v2010_v30 = vor.u32 %v2136_v27, %v2009_v26 }
  0xbf   : > { %v394_v39 = vpop.xlane.xlu2 %393 }
  0xc0   : > { %v458_v41 = vmul.f32 %v2742_v13, %v394_v39 }
  0xc2   : > { %v2790_v44 = vsub.f32 %v355_v6, %v458_v41  ;;  %v2141_v6 = vld [vmem:[#allocation7 + $0x44] sm:$0xf]  ;;  %1222 = vmatpush.bf16.msra.mxu0 %v2026_v14  ;;  %v2134_v41 = vld [vmem:[#allocation7 + $0x4] sm:$0xf0] }
  0xc3   : > { %v2038_v9 = vor.u32 %v2141_v6, %v2035_v8 }
  0xc4   : > { %v522_v45 = vmul.f32 %v2790_v44, %v2790_v44 }
  0xc5   : > { %556 = vadd.xlane.f32.xlu2 %v520_v34  ;;  %397 = vadd.xlane.f32.xlu0 %v2773_v36  ;;  %v2011_v34 = vld [vmem:[#allocation7 + $0x18] sm:$0xf0] }
  0xc6   : > { %552 = vadd.xlane.f32.xlu1 %v518_v37  ;;  %1310 = vmatpush.bf16.msra.mxu1 %v2038_v9  ;;  %v2014_v37 = vor.u32 %v2135_v31, %v2011_v34 }
  0xc7   : > { %1223 = vmatpush.bf16.msra.mxu0 %v2018_v21 }
  0xca   : > { %1311 = vmatpush.bf16.msra.mxu1 %v2030_v16 }
  0xcb   : > { %1224 = vmatpush.bf16.msra.mxu0 %v2010_v30 }
  0xcd   : > { %403 = vadd.xlane.f32.xlu2 %v2784_v42  ;;  %558 = vadd.xlane.f32.xlu0 %v521_v40  ;;  %v2001_v40 = vld [vmem:[#allocation7] sm:$0xf] }
  0xce   : > { %399 = vadd.xlane.f32.xlu1 %v2787_v43  ;;  %1312 = vmatpush.bf16.msra.mxu1 %v2022_v23 }
  0xd2   : > { %1313 = vmatpush.bf16.msra.mxu1 %v2014_v37 }
  0xd5   : > { %405 = vadd.xlane.f32.xlu2 %v2796_v46  ;;  %560 = vadd.xlane.f32.xlu0 %v522_v45  ;;  %v2002_v45 = vor.u32 %v2134_v41, %v2001_v40  ;;  %v2949_v41 = vld [vmem:[%s2721_s9 + $0x98] sm:$0xff] }
  0xd6   : > { %401 = vadd.xlane.f32.xlu1 %v2799_v47  ;;  %1314 = vmatpush.bf16.msra.mxu1 %v2006_v52 }
  0xd7   : > { %1225 = vmatpush.bf16.msra.mxu0 %v2002_v45 }
  0xdd   : > { %407 = vadd.xlane.f32.xlu0 %v2804_v48 }
  0xe5   : > { %409 = vadd.xlane.f32.xlu0 %v2808_v49 }
 0x128   : > { %v549_v29 = vpop.xlane.xlu0 %548 }
 0x129   : > { %v612_v35 = vmul.f32 %v549_v29, %v2742_v13 }
 0x12b   : > { %v644_v39 = vadd.f32 1e-05, %v612_v35 }
 0x12d   : > { %2255 = vrsqrt.f32 %v644_v39  ;;  %vm682_vm2 = vweird.f32 %v644_v39 }
 0x130   : > { %v555_v53 = vpop.xlane.xlu2 %554  ;;  %v396_v54 = vpop.xlane.xlu0 %395 }
 0x131   : > { %v615_v55 = vmul.f32 %v555_v53, %v2742_v13  ;;  %v551_v56 = vpop.xlane.xlu1 %550  ;;  %v459_v57 = vmul.f32 %v2742_v13, %v396_v54  ;;  %v2874_v53 = vld [vmem:[%s2721_s9 + $0x78] sm:$0xff] }
 0x132   : > { %v613_v58 = vmul.f32 %v551_v56, %v2742_v13 }
 0x133   : > { %v2256_v59 = vpop.eup %2255  ;;  %v2815_v60 = vadd.f32 1e-05, %v615_v55  ;;  %v2818_v61 = vsub.f32 %v2758_v28, %v459_v57 }
 0x134   : > { %v677_v62 = vmul.f32 %v2256_v59, %v644_v39  ;;  %v645_v63 = vadd.f32 1e-05, %v613_v58  ;;  %vm683_vm1 = vweird.f32 %v2256_v59 }
 0x135   : > { %2257 = vrsqrt.f32 %v2815_v60  ;;  %v523_v0 = vmul.f32 %v2818_v61, %v2818_v61  ;;  %vm2840_vm5 = vmor %vm682_vm2, %vm683_vm1  ;;  %vm712_vm9 = vweird.f32 %v2815_v60 }
 0x136   : > { %v678_v1 = vmul.f32 %v2256_v59, %v677_v62  ;;  %2259 = vrsqrt.f32 %v645_v63  ;;  %vm692_vm3 = vweird.f32 %v645_v63 }
 0x137   : > { %562 = vadd.xlane.f32.xlu1 %v523_v0 }
 0x138   : > { %v679_v2 = vmul.f32 0.5, %v678_v1  ;;  %v557_v3 = vpop.xlane.xlu2 %556  ;;  %v398_v4 = vpop.xlane.xlu0 %397 }
 0x139   : > { %v553_v5 = vpop.xlane.xlu1 %552  ;;  %v460_v6 = vmul.f32 %v2742_v13, %v398_v4  ;;  %v616_v15 = vmul.f32 %v557_v3, %v2742_v13  ;;  %v2894_v4 = vld [vmem:[%s3836_s2] ss:$0 sm:$0xff] }
 0x13a   : > { %v614_v7 = vmul.f32 %v553_v5, %v2742_v13  ;;  %v680_v8 = vsub.f32 1.5, %v679_v2 }
 0x13b   : > { %v2825_v28 = vpop.eup %2257  ;;  %v2828_v9 = vsub.f32 %v2773_v36, %v460_v6  ;;  %v2845_v30 = vadd.f32 1e-05, %v616_v15 }
 0x13c   : > { %v2260_v10 = vpop.eup %2259  ;;  %v2830_v11 = vadd.f32 1e-05, %v614_v7  ;;  %v707_v14 = vmul.f32 %v2825_v28, %v2815_v60  ;;  %v681_v18 = vmul.f32 %v2256_v59, %v680_v8  ;;  %vm713_vm10 = vweird.f32 %v2825_v28 }
 0x13d   : > { %v687_v12 = vmul.f32 %v2260_v10, %v645_v63  ;;  %v524_v16 = vmul.f32 %v2828_v9, %v2828_v9  ;;  %vm693_vm4 = vweird.f32 %v2260_v10  ;;  %vm2930_vm12 = vmor %vm712_vm9, %vm713_vm10  ;;  %vm722_vm15 = vweird.f32 %v2845_v30 }
 0x13e   : > { %2261 = vrsqrt.f32 %v2830_v11  ;;  %v708_v29 = vmul.f32 %v2825_v28, %v707_v14  ;;  %v685_v39 = vsel %vm2840_vm5, %v2256_v59, %v681_v18  ;;  %vm2858_vm6 = vmor %vm692_vm3, %vm693_vm4  ;;  %vm702_vm7 = vweird.f32 %v2830_v11  ;;  %v2925_v18 = vld [vmem:[%s2721_s9 + $0x80] sm:$0xff] }
 0x13f   : > { %v688_v19 = vmul.f32 %v2260_v10, %v687_v12  ;;  %564 = vadd.xlane.f32.xlu1 %v524_v16  ;;  %v996_v54 = vmul.f32 %v685_v39, %v2745_v17 }
 0x140   : > { %v404_v36 = vpop.xlane.xlu2 %403  ;;  %v559_v20 = vpop.xlane.xlu0 %558  ;;  %v709_v55 = vmul.f32 0.5, %v708_v29 }
 0x141   : > { %v689_v21 = vmul.f32 0.5, %v688_v19  ;;  %v463_v22 = vmul.f32 %v2742_v13, %v404_v36  ;;  %v400_v23 = vpop.xlane.xlu1 %399  ;;  %v617_v26 = vmul.f32 %v559_v20, %v2742_v13 }
 0x142   : > { %v461_v31 = vmul.f32 %v2742_v13, %v400_v23  ;;  %v710_v5 = vsub.f32 1.5, %v709_v55 }
 0x143   : > { %v690_v34 = vsub.f32 1.5, %v689_v21  ;;  %v2849_v35 = vsub.f32 %v2784_v42, %v463_v22  ;;  %v2851_v37 = vadd.f32 1e-05, %v617_v26 }
 0x144   : > { %v2855_v40 = vpop.eup %2261  ;;  %v2863_v45 = vsub.f32 %v2787_v43, %v461_v31  ;;  %v2877_v43 = vld [vmem:[#allocation5] ss:$0 sm:$0xff]  ;;  %v711_v19 = vmul.f32 %v2825_v28, %v710_v5 }
 0x145   : > { %v691_v50 = vmul.f32 %v2260_v10, %v690_v34  ;;  %v697_v42 = vmul.f32 %v2855_v40, %v2830_v11  ;;  %2263 = vrsqrt.f32 %v2851_v37  ;;  %v527_v51 = vmul.f32 %v2849_v35, %v2849_v35 }
 0x146   : > { %2265 = vrsqrt.f32 %v2845_v30  ;;  %v525_v52 = vmul.f32 %v2863_v45, %v2863_v45  ;;  %v1032_v2 = vmul.f32 %v2877_v43, %v996_v54  ;;  %vm703_vm8 = vweird.f32 %v2855_v40 }
 0x147   : > { %v698_v56 = vmul.f32 %v2855_v40, %v697_v42  ;;  %v695_v57 = vsel %vm2858_vm6, %v2260_v10, %v691_v50  ;;  %570 = vadd.xlane.f32.xlu0 %v527_v51  ;;  %411 = vadd.xlane.f32.xlu1 %v2874_v53  ;;  %vm2916_vm11 = vmor %vm702_vm7, %vm703_vm8  ;;  %v715_v31 = vsel %vm2930_vm12, %v2825_v28, %v711_v19  ;;  %v2952_v50 = vld [vmem:[%s2721_s9 + $0x88] sm:$0xff]  ;;  %vm732_vm13 = vweird.f32 %v2851_v37 }
 0x148   : > { %566 = vadd.xlane.f32.xlu2 %v525_v52  ;;  %v406_v58 = vpop.xlane.xlu2 %405  ;;  %v2882_v59 = vpop.xlane.xlu0 %560  ;;  %v997_v62 = vmul.f32 %v695_v57, %v2753_v25  ;;  %v1068_v60 = vadd.f32 %v2894_v4, %v1032_v2  ;;  %v999_v42 = vmul.f32 %v715_v31, %v2751_v24  ;;  %v2987_v2 = vld [vmem:[%s2721_s9 + $0xa8] sm:$0xff]  ;;  %v2160_v31 = vld [vmem:[#allocation8 + $0x58] sm:$0xff] }
 0x149   : > { %v699_v63 = vmul.f32 0.5, %v698_v56  ;;  %v464_v17 = vmul.f32 %v2742_v13, %v406_v58  ;;  %v402_v0 = vpop.xlane.xlu1 %401  ;;  %v2972_v58 = vld [vmem:[%s2721_s9 + $0xa0] sm:$0xff]  ;;  %v2154_v19 = vld [vmem:[#allocation8 + $0x28] sm:$0xff] }
 0x14a   : > { %v462_v1 = vmul.f32 %v2742_v13, %v402_v0  ;;  %v1033_v3 = vmul.f32 %v2877_v43, %v997_v62  ;;  %v1035_v54 = vmul.f32 %v2877_v43, %v999_v42  ;;  %v2975_v62 = vld [vmem:[%s2721_s9 + $0x90] sm:$0xff] }
 0x14b   : > { %v2896_v25 = vpop.eup %2263  ;;  %v700_v6 = vsub.f32 1.5, %v699_v63  ;;  %v2900_v7 = vsub.f32 %v2796_v46, %v464_v17  ;;  %v2164_v46 = vld [vmem:[#allocation8 + $0x78] sm:$0xff] }
 0x14c   : > { %v2902_v8 = vpop.eup %2265  ;;  %v2906_v10 = vsub.f32 %v2799_v47, %v462_v1  ;;  %v727_v14 = vmul.f32 %v2896_v25, %v2851_v37  ;;  %v1069_v16 = vadd.f32 %v2894_v4, %v1033_v3  ;;  %vm733_vm14 = vweird.f32 %v2896_v25  ;;  %1713 = vmatpush.bf16.msra.mxu3 %v2164_v46 }
 0x14d   : > { %v701_v12 = vmul.f32 %v2855_v40, %v700_v6  ;;  %v528_v15 = vmul.f32 %v2900_v7, %v2900_v7  ;;  %v717_v36 = vmul.f32 %v2902_v8, %v2845_v30  ;;  %vm723_vm0 = vweird.f32 %v2902_v8  ;;  %vm734_vm1 = vmor %vm732_vm13, %vm733_vm14 }
 0x14e   : > { %v526_v47 = vmul.f32 %v2906_v10, %v2906_v10  ;;  %v1100_v20 = vpack.c.bf16 %v1069_v16, %v1068_v60  ;;  %v728_v22 = vmul.f32 %v2896_v25, %v727_v14  ;;  %vm724_vm2 = vmor %vm722_vm15, %vm723_vm0  ;;  %v2996_v14 = vld [vmem:[%s2721_s9 + $0xb0] sm:$0xff] }
 0x14f   : > { %572 = vadd.xlane.f32.xlu0 %v528_v15  ;;  %413 = vadd.xlane.f32.xlu1 %v2925_v18  ;;  %v705_v26 = vsel %vm2916_vm11, %v2855_v40, %v701_v12  ;;  %v718_v27 = vmul.f32 %v2902_v8, %v717_v36  ;;  %v2163_v60 = vld [vmem:[#allocation8 + $0x70] sm:$0xff]  ;;  %v2162_v36 = vld [vmem:[#allocation8 + $0x68] sm:$0xff] }
 0x150   : > { %568 = vadd.xlane.f32.xlu2 %v526_v47  ;;  %v408_v21 = vpop.xlane.xlu0 %407  ;;  %1226 = vmatmul.bf16.vlgmr.msra.gmra.mxu0 %v1100_v20  ;;  %v998_v34 = vmul.f32 %v705_v26, %v2767_v33  ;;  %v729_v39 = vmul.f32 0.5, %v728_v22  ;;  %v2155_v47 = vld [vmem:[#allocation8 + $0x30] sm:$0xff] }
 0x151   : > { %v465_v23 = vmul.f32 %v2742_v13, %v408_v21  ;;  %1315 = vmatmul.bf16.vlgmr.msra.gmra.mxu1 %v1100_v20  ;;  %v719_v51 = vmul.f32 0.5, %v718_v27  ;;  %1714 = vmatpush.bf16.msra.mxu3 %v2163_v60  ;;  %v2161_v21 = vld [vmem:[#allocation8 + $0x60] sm:$0xff]  ;;  %v2152_v27 = vld [vmem:[#allocation8 + $0x18] sm:$0xff] }
 0x152   : > { %v1034_v33 = vmul.f32 %v2877_v43, %v998_v34  ;;  %v730_v28 = vsub.f32 1.5, %v729_v39  ;;  %v2151_v39 = vld [vmem:[#allocation8 + $0x10] sm:$0xff] }
 0x153   : > { %v2942_v29 = vsub.f32 %v2804_v48, %v465_v23  ;;  %v720_v55 = vsub.f32 1.5, %v719_v51 }
 0x154   : > { %v1070_v56 = vadd.f32 %v2894_v4, %v1034_v33  ;;  %v731_v57 = vmul.f32 %v2896_v25, %v730_v28 }
 0x155   : > { %v529_v40 = vmul.f32 %v2942_v29, %v2942_v29  ;;  %v721_v63 = vmul.f32 %v2902_v8, %v720_v55  ;;  %1715 = vmatpush.bf16.msra.mxu3 %v2162_v36  ;;  %v2158_v55 = vld [vmem:[#allocation8 + $0x48] sm:$0xff] }
 0x156   : > { %v735_v17 = vsel %vm734_vm1, %v2896_v25, %v731_v57 }
 0x157   : > { %419 = vadd.xlane.f32.xlu0 %v2949_v41  ;;  %574 = vadd.xlane.f32.xlu1 %v529_v40  ;;  %v725_v0 = vsel %vm724_vm2, %v2902_v8, %v721_v63  ;;  %v1001_v1 = vmul.f32 %v735_v17, %v2778_v38  ;;  %v2156_v8 = vld [vmem:[#allocation8 + $0x38] sm:$0xff]  ;;  %v2159_v40 = vld [vmem:[#allocation8 + $0x50] sm:$0xff]  ;;  %v2149_v63 = vld [vmem:[#allocation8] sm:$0xff] }
 0x158   : > { %415 = vadd.xlane.f32.xlu2 %v2952_v50  ;;  %v410_v48 = vpop.xlane.xlu0 %409  ;;  %v1000_v3 = vmul.f32 %v725_v0, %v2765_v32  ;;  %v618_v32 = vmul.f32 %v2882_v59, %v2742_v13  ;;  %1624 = vmatpush.bf16.msra.mxu2 %v2156_v8  ;;  %v2153_v59 = vld [vmem:[#allocation8 + $0x20] sm:$0xff] }
 0x159   : > { %v466_v52 = vmul.f32 %v2742_v13, %v410_v48  ;;  %v1037_v5 = vmul.f32 %v2877_v43, %v1001_v1  ;;  %1716 = vmatpush.bf16.msra.mxu3 %v2161_v21 }
 0x15a   : > { %v1036_v6 = vmul.f32 %v2877_v43, %v1000_v3  ;;  %v650_v38 = vadd.f32 1e-05, %v618_v32 }
 0x15b   : > { %v2965_v24 = vsub.f32 %v2808_v49, %v466_v52  ;;  %v1071_v49 = vadd.f32 %v2894_v4, %v1035_v54  ;;  %v1073_v12 = vadd.f32 %v2894_v4, %v1037_v5  ;;  %v2150_v54 = vld [vmem:[#allocation8 + $0x8] sm:$0xff] }
 0x15c   : > { %v1072_v25 = vadd.f32 %v2894_v4, %v1036_v6  ;;  %2267 = vrsqrt.f32 %v650_v38  ;;  %1625 = vmatpush.bf16.msra.mxu2 %v2155_v47  ;;  %vm742_vm3 = vweird.f32 %v650_v38 }
 0x15d   : > { %v530_v37 = vmul.f32 %v2965_v24, %v2965_v24  ;;  %v1101_v30 = vpack.c.bf16 %v1071_v49, %v1070_v56  ;;  %1717 = vmatpush.bf16.msra.mxu3 %v2160_v31 }
 0x15e   : > { %v1102_v15 = vpack.c.bf16 %v1073_v12, %v1072_v25 }
 0x15f   : > { %421 = vadd.xlane.f32.xlu0 %v2972_v58  ;;  %576 = vadd.xlane.f32.xlu1 %v530_v37 }
 0x160   : > { %417 = vadd.xlane.f32.xlu2 %v2975_v62  ;;  %1231 = vmatmul.bf16.gmra.mxu0 %v1101_v30 }
 0x161   : > { %1320 = vmatmul.bf16.gmra.mxu1 %v1101_v30  ;;  %1626 = vmatpush.bf16.msra.mxu2 %v2154_v19  ;;  %v2157_v30 = vld [vmem:[#allocation8 + $0x40] sm:$0xff] }
 0x162   : > { %v3001_v16 = vpop.eup %2267  ;;  %1718 = vmatpush.bf16.msra.mxu3 %v2159_v40 }
 0x163   : > { %v737_v11 = vmul.f32 %v3001_v16, %v650_v38  ;;  %vm743_vm4 = vweird.f32 %v3001_v16 }
 0x164   : > { %vm3012_vm5 = vmor %vm742_vm3, %vm743_vm4 }
 0x165   : > { %1627 = vmatpush.bf16.msra.mxu2 %v2153_v59  ;;  %v738_v23 = vmul.f32 %v3001_v16, %v737_v11 }
 0x166   : > { %1719 = vmatpush.bf16.msra.mxu3 %v2158_v55 }
 0x167   : > { %423 = vadd.xlane.f32.xlu1 %v2987_v2  ;;  %v739_v34 = vmul.f32 0.5, %v738_v23 }
 0x169   : > { %1628 = vmatpush.bf16.msra.mxu2 %v2152_v27  ;;  %v740_v33 = vsub.f32 1.5, %v739_v34 }
 0x16a   : > { %1720 = vmatpush.bf16.msra.mxu3 %v2157_v30 }
 0x16b   : > { %v741_v57 = vmul.f32 %v3001_v16, %v740_v33 }
 0x16d   : > { %1629 = vmatpush.bf16.msra.mxu2 %v2151_v39  ;;  %v745_v25 = vsel %vm3012_vm5, %v3001_v16, %v741_v57 }
 0x16e   : > { %v1002_v16 = vmul.f32 %v745_v25, %v2790_v44 }
 0x16f   : > { %425 = vadd.xlane.f32.xlu1 %v2996_v14 }
 0x170   : > { %1236 = vmatmul.bf16.gmra.mxu0 %v1102_v15  ;;  %v1038_v44 = vmul.f32 %v2877_v43, %v1002_v16 }
 0x171   : > { %1325 = vmatmul.bf16.gmra.mxu1 %v1102_v15  ;;  %1630 = vmatpush.bf16.msra.mxu2 %v2150_v54 }
 0x172   : > { %v1074_v33 = vadd.f32 %v2894_v4, %v1038_v44 }
 0x175   : > { %1631 = vmatpush.bf16.msra.mxu2 %v2149_v63  ;;  %v1132_v63 = vld [vmem:[%s3838_s4] sm:$0x3] }
 0x1aa   : > { %v563_v20 = vpop.xlane.xlu1 %562 }
 0x1ab   : > { %v619_v22 = vmul.f32 %v563_v20, %v2742_v13 }
 0x1ad   : > { %v651_v26 = vadd.f32 1e-05, %v619_v22 }
 0x1af   : > { %2269 = vrsqrt.f32 %v651_v26  ;;  %vm752_vm7 = vweird.f32 %v651_v26 }
 0x1b2   : > { %v565_v42 = vpop.xlane.xlu1 %564 }
 0x1b3   : > { %v620_v51 = vmul.f32 %v565_v42, %v2742_v13 }
 0x1b5   : > { %v2270_v48 = vpop.eup %2269  ;;  %v3007_v52 = vadd.f32 1e-05, %v620_v51 }
 0x1b6   : > { %v747_v28 = vmul.f32 %v2270_v48, %v651_v26  ;;  %vm753_vm6 = vweird.f32 %v2270_v48 }
 0x1b7   : > { %2271 = vrsqrt.f32 %v3007_v52  ;;  %vm754_vm8 = vmor %vm752_vm7, %vm753_vm6  ;;  %vm762_vm10 = vweird.f32 %v3007_v52 }
 0x1b8   : > { %v748_v56 = vmul.f32 %v2270_v48, %v747_v28 }
 0x1ba   : > { %v749_v49 = vmul.f32 0.5, %v748_v56  ;;  %v571_v0 = vpop.xlane.xlu0 %570  ;;  %v412_v5 = vpop.xlane.xlu1 %411 }
 0x1bb   : > { %v567_v17 = vpop.xlane.xlu2 %566  ;;  %v623_v6 = vmul.f32 %v571_v0, %v2742_v13  ;;  %v467_v12 = vmul.f32 %v2742_v13, %v412_v5 }
 0x1bc   : > { %v750_v1 = vsub.f32 1.5, %v749_v49  ;;  %v621_v3 = vmul.f32 %v567_v17, %v2742_v13 }
 0x1bd   : > { %v3022_v15 = vpop.eup %2271  ;;  %v3026_v8 = vadd.f32 1e-05, %v623_v6  ;;  %v3031_v47 = vsub.f32 %v2874_v53, %v467_v12 }
 0x1be   : > { %v751_v32 = vmul.f32 %v2270_v48, %v750_v1  ;;  %v3024_v38 = vadd.f32 1e-05, %v621_v3  ;;  %v757_v46 = vmul.f32 %v3022_v15, %v3007_v52  ;;  %vm763_vm9 = vweird.f32 %v3022_v15 }
 0x1bf   : > { %v531_v36 = vmul.f32 %v3031_v47, %v3031_v47  ;;  %vm3082_vm13 = vmor %vm762_vm10, %vm763_vm9  ;;  %vm792_vm15 = vweird.f32 %v3026_v8 }
 0x1c0   : > { %2273 = vrsqrt.f32 %v3024_v38  ;;  %v755_v60 = vsel %vm754_vm8, %v2270_v48, %v751_v32  ;;  %v758_v19 = vmul.f32 %v3022_v15, %v757_v46  ;;  %vm772_vm11 = vweird.f32 %v3024_v38 }
 0x1c1   : > { %2275 = vrsqrt.f32 %v3026_v8  ;;  %v1003_v11 = vmul.f32 %v755_v60, %v2818_v61  ;;  %578 = vadd.xlane.f32.xlu2 %v531_v36  ;;  %v3093_v32 = vperm.slane %v1132_v63, 0 }
 0x1c2   : > { %v759_v20 = vmul.f32 0.5, %v758_v19  ;;  %v573_v21 = vpop.xlane.xlu0 %572  ;;  %v414_v23 = vpop.xlane.xlu1 %413 }
 0x1c3   : > { %v569_v59 = vpop.xlane.xlu2 %568  ;;  %v1039_v53 = vmul.f32 %v2877_v43, %v1003_v11  ;;  %v468_v26 = vmul.f32 %v2742_v13, %v414_v23  ;;  %v624_v34 = vmul.f32 %v573_v21, %v2742_v13  ;;  %v3120_v23 = vperm.slane %v1132_v63, 1 }
 0x1c4   : > { %v622_v22 = vmul.f32 %v569_v59, %v2742_v13  ;;  %v760_v40 = vsub.f32 1.5, %v759_v20  ;;  %v3110_v20 = vld [vmem:[%s2721_s9 + $0xb8] sm:$0xff] }
 0x1c5   : > { %v1075_v61 = vadd.f32 %v2894_v4, %v1039_v53  ;;  %v3055_v51 = vsub.f32 %v2925_v18, %v468_v26  ;;  %v3064_v55 = vadd.f32 1e-05, %v624_v34 }
 0x1c6   : > { %v3044_v27 = vpop.eup %2273  ;;  %v3046_v31 = vadd.f32 1e-05, %v622_v22  ;;  %v761_v57 = vmul.f32 %v3022_v15, %v760_v40 }
 0x1c7   : > { %v3050_v39 = vpop.eup %2275  ;;  %v767_v42 = vmul.f32 %v3044_v27, %v3024_v38  ;;  %v532_v54 = vmul.f32 %v3055_v51, %v3055_v51  ;;  %v1103_v56 = vpack.c.bf16 %v1075_v61, %v1074_v33  ;;  %vm773_vm12 = vweird.f32 %v3044_v27 }
 0x1c8   : > { %v787_v48 = vmul.f32 %v3050_v39, %v3026_v8  ;;  %2277 = vrsqrt.f32 %v3046_v31  ;;  %v765_v11 = vsel %vm3082_vm13, %v3022_v15, %v761_v57  ;;  %vm3105_vm14 = vmor %vm772_vm11, %vm773_vm12  ;;  %vm793_vm0 = vweird.f32 %v3050_v39 }
 0x1c9   : > { %v768_v28 = vmul.f32 %v3044_v27, %v767_v42  ;;  %580 = vadd.xlane.f32.xlu2 %v532_v54  ;;  %1241 = vmatmul.bf16.gmra.mxu0 %v1103_v56  ;;  %2279 = vrsqrt.f32 %v3064_v55  ;;  %v1004_v15 = vmul.f32 %v765_v11, %v2828_v9  ;;  %vm782_vm1 = vweird.f32 %v3046_v31  ;;  %vm3173_vm4 = vmor %vm792_vm15, %vm793_vm0 }
 0x1ca   : > { %v420_v49 = vpop.xlane.xlu0 %419  ;;  %v788_v30 = vmul.f32 %v3050_v39, %v787_v48  ;;  %1330 = vmatmul.bf16.gmra.mxu1 %v1103_v56  ;;  %v575_v0 = vpop.xlane.xlu1 %574  ;;  %vm802_vm5 = vweird.f32 %v3064_v55 }
 0x1cb   : > { %v769_v18 = vmul.f32 0.5, %v768_v28  ;;  %v416_v37 = vpop.xlane.xlu2 %415  ;;  %v471_v1 = vmul.f32 %v2742_v13, %v420_v49  ;;  %v625_v5 = vmul.f32 %v575_v0, %v2742_v13  ;;  %v1040_v56 = vmul.f32 %v2877_v43, %v1004_v15 }
 0x1cc   : > { %v469_v17 = vmul.f32 %v2742_v13, %v416_v37 }
 0x1cd   : > { %v770_v3 = vsub.f32 1.5, %v769_v18  ;;  %v3091_v25 = vsub.f32 %v2949_v41, %v471_v1  ;;  %v3098_v16 = vadd.f32 1e-05, %v625_v5  ;;  %v1227_v19 = vpop.f32.mrf.mxu0 }
 0x1ce   : > { %v3078_v6 = vpop.eup %2277  ;;  %v3088_v12 = vsub.f32 %v2952_v50, %v469_v17  ;;  %v1316_v36 = vpop.f32.mrf.mxu1  ;;  %v789_v50 = vmul.f32 0.5, %v788_v30  ;;  %v1228_v22 = vadd.f32 %v1227_v19, %v3093_v32  ;;  %v3153_v17 = vld [vmem:[%s2721_s9 + $0xc0] sm:$0xff] }
 0x1cf   : > { %v771_v46 = vmul.f32 %v3044_v27, %v770_v3  ;;  %v777_v60 = vmul.f32 %v3078_v6, %v3046_v31  ;;  %2281 = vrsqrt.f32 %v3098_v16  ;;  %v535_v53 = vmul.f32 %v3091_v25, %v3091_v25  ;;  %v3126_v61 = vpop.eup %2279 }
 0x1d0   : > { %v533_v21 = vmul.f32 %v3088_v12, %v3088_v12  ;;  %v790_v40 = vsub.f32 1.5, %v789_v50  ;;  %vm783_vm2 = vweird.f32 %v3078_v6  ;;  %v1396_v63 = vmax.f32 %v1228_v22, 0.0 }
 0x1d1   : > { %v778_v59 = vmul.f32 %v3078_v6, %v777_v60  ;;  %427 = vadd.xlane.f32.xlu2 %v3110_v20  ;;  %v775_v34 = vsel %vm3105_vm14, %v3044_v27, %v771_v46  ;;  %586 = vadd.xlane.f32.xlu1 %v535_v53  ;;  %vm3161_vm3 = vmor %vm782_vm1, %vm783_vm2  ;;  %v1076_v46 = vadd.f32 %v2894_v4, %v1040_v56  ;;  %v3197_v56 = vld [vmem:[%s2721_s9 + $0xd8] sm:$0xff]  ;;  %vm812_vm6 = vweird.f32 %v3098_v16 }
 0x1d2   : > { %v422_v26 = vpop.xlane.xlu0 %421  ;;  %582 = vadd.xlane.f32.xlu0 %v533_v21  ;;  %v3129_v42 = vpop.xlane.xlu1 %576  ;;  %v1005_v33 = vmul.f32 %v775_v34, %v2863_v45  ;;  %v1317_v45 = vadd.f32 %v1316_v36, %v3120_v23  ;;  %v791_v49 = vmul.f32 %v3050_v39, %v790_v40  ;;  %vm803_vm8 = vweird.f32 %v3126_v61 }
 0x1d3   : > { %v779_v38 = vmul.f32 0.5, %v778_v59  ;;  %v418_v44 = vpop.xlane.xlu2 %417  ;;  %v472_v48 = vmul.f32 %v2742_v13, %v422_v26  ;;  %vm3238_vm10 = vmor %vm802_vm5, %vm803_vm8 }
 0x1d4   : > { %v470_v9 = vmul.f32 %v2742_v13, %v418_v44  ;;  %v1041_v57 = vmul.f32 %v2877_v43, %v1005_v33  ;;  %v1397_v11 = vmax.f32 %v1317_v45, 0.0  ;;  %v795_v44 = vsel %vm3173_vm4, %v3050_v39, %v791_v49 }
 0x1d5   : > { %v780_v28 = vsub.f32 1.5, %v779_v38  ;;  %v3138_v27 = vsub.f32 %v2972_v58, %v472_v48  ;;  %v3142_v18 = vpop.eup %2281  ;;  %v1229_v37 = vpop.f32.mrf.mxu0  ;;  %v797_v58 = vmul.f32 %v3126_v61, %v3064_v55  ;;  %v1007_v39 = vmul.f32 %v795_v44, %v2849_v35 }
 0x1d6   : > { %v3135_v54 = vsub.f32 %v2975_v62, %v470_v9  ;;  %v1318_v62 = vpop.f32.mrf.mxu1  ;;  %v1230_v30 = vadd.f32 %v1229_v37, %v3093_v32  ;;  %v807_v31 = vmul.f32 %v3142_v18, %v3098_v16  ;;  %v1077_v60 = vadd.f32 %v2894_v4, %v1041_v57 }
 0x1d7   : > { %v781_v0 = vmul.f32 %v3078_v6, %v780_v28  ;;  %v1319_v1 = vadd.f32 %v1318_v62, %v3120_v23  ;;  %v536_v19 = vmul.f32 %v3138_v27, %v3138_v27  ;;  %v798_v50 = vmul.f32 %v3126_v61, %v797_v58  ;;  %v3192_v28 = vld [vmem:[%s2721_s9 + $0xc8] sm:$0xff] }
 0x1d8   : > { %v534_v3 = vmul.f32 %v3135_v54, %v3135_v54  ;;  %v1398_v52 = vmax.f32 %v1230_v30, 0.0  ;;  %v1104_v59 = vpack.c.bf16 %v1077_v60, %v1076_v46  ;;  %v808_v15 = vmul.f32 %v3142_v18, %v807_v31  ;;  %v3226_v60 = vld [vmem:[%s2721_s9 + $0xe0] sm:$0xff] }
 0x1d9   : > { %v1399_v41 = vmax.f32 %v1319_v1, 0.0  ;;  %429 = vadd.xlane.f32.xlu2 %v3153_v17  ;;  %588 = vadd.xlane.f32.xlu1 %v536_v19  ;;  %v785_v22 = vsel %vm3161_vm3, %v3078_v6, %v781_v0  ;;  %v799_v48 = vmul.f32 0.5, %v798_v50  ;;  %v1043_v62 = vmul.f32 %v2877_v43, %v1007_v39 }
 0x1da   : > { %584 = vadd.xlane.f32.xlu0 %v534_v3  ;;  %v424_v21 = vpop.xlane.xlu1 %423  ;;  %v1460_v53 = vpack.c.bf16 %v1398_v52, %v1396_v63  ;;  %1246 = vmatmul.bf16.gmra.mxu0 %v1104_v59  ;;  %v1006_v9 = vmul.f32 %v785_v22, %v2906_v10  ;;  %v809_v33 = vmul.f32 0.5, %v808_v15  ;;  %vm813_vm7 = vweird.f32 %v3142_v18  ;;  %v3220_v52 = vld [vmem:[%s2721_s9 + $0xd0] sm:$0xff]  ;;  %v3251_v22 = vld [vmem:[%s2721_s9 + $0xe8] sm:$0xff] }
 0x1db   : > { %v473_v8 = vmul.f32 %v2742_v13, %v424_v21  ;;  %v1461_v38 = vpack.c.bf16 %v1399_v41, %v1397_v11  ;;  %1335 = vmatmul.bf16.gmra.mxu1 %v1104_v59  ;;  %v800_v10 = vsub.f32 1.5, %v799_v48  ;;  %v1079_v46 = vadd.f32 %v2894_v4, %v1043_v62  ;;  %vm3230_vm9 = vmor %vm812_vm6, %vm813_vm7 }
 0x1dc   : > { %1632 = vmatmul.bf16.vlgmr.msra.gmra.mxu2 %v1460_v53  ;;  %v1042_v57 = vmul.f32 %v2877_v43, %v1006_v9  ;;  %v810_v45 = vsub.f32 1.5, %v809_v33 }
 0x1dd   : > { %v3188_v26 = vsub.f32 %v2987_v2, %v473_v8  ;;  %1721 = vmatmul.bf16.vlgmr.msra.gmra.mxu3 %v1461_v38  ;;  %v1232_v34 = vpop.f32.mrf.mxu0  ;;  %v801_v3 = vmul.f32 %v3126_v61, %v800_v10 }
 0x1de   : > { %v1321_v40 = vpop.f32.mrf.mxu1  ;;  %v1233_v49 = vadd.f32 %v1232_v34, %v3093_v32  ;;  %v1078_v1 = vadd.f32 %v2894_v4, %v1042_v57  ;;  %v811_v5 = vmul.f32 %v3142_v18, %v810_v45 }
 0x1df   : > { %v537_v6 = vmul.f32 %v3188_v26, %v3188_v26  ;;  %v1322_v58 = vadd.f32 %v1321_v40, %v3120_v23  ;;  %v805_v55 = vsel %vm3238_vm10, %v3126_v61, %v801_v3 }
 0x1e0   : > { %v1400_v36 = vmax.f32 %v1233_v49, 0.0  ;;  %v1105_v16 = vpack.c.bf16 %v1079_v46, %v1078_v1  ;;  %v815_v15 = vsel %vm3230_vm9, %v3142_v18, %v811_v5  ;;  %v1008_v34 = vmul.f32 %v805_v55, %v2900_v7 }
 0x1e1   : > { %590 = vadd.xlane.f32.xlu2 %v537_v6  ;;  %435 = vadd.xlane.f32.xlu1 %v3197_v56  ;;  %v1401_v11 = vmax.f32 %v1322_v58, 0.0  ;;  %v1009_v44 = vmul.f32 %v815_v15, %v2942_v29 }
 0x1e2   : > { %431 = vadd.xlane.f32.xlu0 %v3192_v28  ;;  %v426_v2 = vpop.xlane.xlu1 %425  ;;  %v1044_v40 = vmul.f32 %v2877_v43, %v1008_v34 }
 0x1e3   : > { %v474_v37 = vmul.f32 %v2742_v13, %v426_v2  ;;  %v1045_v18 = vmul.f32 %v2877_v43, %v1009_v44  ;;  %v3263_v2 = vld [vmem:[%s2721_s9 + $0xf0] sm:$0xff] }
 0x1e4   : > { %v1080_v29 = vadd.f32 %v2894_v4, %v1044_v40 }
 0x1e5   : > { %v3211_v35 = vsub.f32 %v2996_v14, %v474_v37  ;;  %v1234_v63 = vpop.f32.mrf.mxu0  ;;  %v1081_v7 = vadd.f32 %v2894_v4, %v1045_v18 }
 0x1e6   : > { %v1323_v30 = vpop.f32.mrf.mxu1  ;;  %v1235_v0 = vadd.f32 %v1234_v63, %v3093_v32  ;;  %v626_v63 = vmul.f32 %v3129_v42, %v2742_v13 }
 0x1e7   : > { %v1324_v31 = vadd.f32 %v1323_v30, %v3120_v23  ;;  %v538_v14 = vmul.f32 %v3211_v35, %v3211_v35  ;;  %v1106_v62 = vpack.c.bf16 %v1081_v7, %v1080_v29 }
 0x1e8   : > { %v1402_v41 = vmax.f32 %v1235_v0, 0.0  ;;  %v658_v30 = vadd.f32 1e-05, %v626_v63 }
 0x1e9   : > { %v1403_v50 = vmax.f32 %v1324_v31, 0.0  ;;  %592 = vadd.xlane.f32.xlu2 %v538_v14  ;;  %437 = vadd.xlane.f32.xlu1 %v3226_v60 }
 0x1ea   : > { %433 = vadd.xlane.f32.xlu0 %v3220_v52  ;;  %v1462_v21 = vpack.c.bf16 %v1402_v41, %v1400_v36  ;;  %1251 = vmatmul.bf16.gmra.mxu0 %v1105_v16  ;;  %2283 = vrsqrt.f32 %v658_v30  ;;  %vm822_vm11 = vweird.f32 %v658_v30 }
 0x1eb   : > { %v1463_v53 = vpack.c.bf16 %v1403_v50, %v1401_v11  ;;  %1340 = vmatmul.bf16.gmra.mxu1 %v1105_v16 }
 0x1ec   : > { %1637 = vmatmul.bf16.gmra.mxu2 %v1462_v21 }
 0x1ed   : > { %1726 = vmatmul.bf16.gmra.mxu3 %v1463_v53  ;;  %v1237_v8 = vpop.f32.mrf.mxu0 }
 0x1ee   : > { %v1326_v38 = vpop.f32.mrf.mxu1  ;;  %v1238_v9 = vadd.f32 %v1237_v8, %v3093_v32 }
 0x1ef   : > { %v1327_v61 = vadd.f32 %v1326_v38, %v3120_v23 }
 0x1f0   : > { %v1404_v57 = vmax.f32 %v1238_v9, 0.0  ;;  %v2284_v0 = vpop.eup %2283 }
 0x1f1   : > { %439 = vadd.xlane.f32.xlu2 %v3251_v22  ;;  %v1405_v10 = vmax.f32 %v1327_v61, 0.0  ;;  %v817_v31 = vmul.f32 %v2284_v0, %v658_v30  ;;  %vm823_vm12 = vweird.f32 %v2284_v0 }
 0x1f2   : > { %vm3275_vm13 = vmor %vm822_vm11, %vm823_vm12 }
 0x1f3   : > { %v818_v3 = vmul.f32 %v2284_v0, %v817_v31 }
 0x1f5   : > { %v1239_v48 = vpop.f32.mrf.mxu0  ;;  %v819_v46 = vmul.f32 0.5, %v818_v3 }
 0x1f6   : > { %v1328_v33 = vpop.f32.mrf.mxu1  ;;  %v1240_v6 = vadd.f32 %v1239_v48, %v3093_v32 }
 0x1f7   : > { %v1329_v39 = vadd.f32 %v1328_v33, %v3120_v23  ;;  %v820_v36 = vsub.f32 1.5, %v819_v46 }
 0x1f8   : > { %v1406_v45 = vmax.f32 %v1240_v6, 0.0 }
 0x1f9   : > { %v1407_v37 = vmax.f32 %v1329_v39, 0.0  ;;  %441 = vadd.xlane.f32.xlu2 %v3263_v2  ;;  %v821_v59 = vmul.f32 %v2284_v0, %v820_v36 }
 0x1fa   : > { %v1464_v49 = vpack.c.bf16 %v1406_v45, %v1404_v57  ;;  %1256 = vmatmul.bf16.gmra.mxu0 %v1106_v62 }
 0x1fb   : > { %v1465_v58 = vpack.c.bf16 %v1407_v37, %v1405_v10  ;;  %1345 = vmatmul.bf16.gmra.mxu1 %v1106_v62  ;;  %v825_v44 = vsel %vm3275_vm13, %v2284_v0, %v821_v59 }
 0x1fc   : > { %1642 = vmatmul.bf16.gmra.mxu2 %v1464_v49  ;;  %v1010_v10 = vmul.f32 %v825_v44, %v2965_v24 }
 0x1fd   : > { %1731 = vmatmul.bf16.gmra.mxu3 %v1465_v58 }
 0x1fe   : > { %v1046_v0 = vmul.f32 %v2877_v43, %v1010_v10 }
 0x200   : > { %v1082_v59 = vadd.f32 %v2894_v4, %v1046_v0 }
 0x234   : > { %v579_v1 = vpop.xlane.xlu2 %578 }
 0x235   : > { %v627_v5 = vmul.f32 %v579_v1, %v2742_v13 }
 0x237   : > { %v659_v14 = vadd.f32 1e-05, %v627_v5 }
 0x239   : > { %2285 = vrsqrt.f32 %v659_v14  ;;  %vm832_vm15 = vweird.f32 %v659_v14 }
 0x23c   : > { %v581_v19 = vpop.xlane.xlu2 %580 }
 0x23d   : > { %v628_v11 = vmul.f32 %v581_v19, %v2742_v13 }
 0x23f   : > { %v2286_v41 = vpop.eup %2285  ;;  %v3272_v50 = vadd.f32 1e-05, %v628_v11 }
 0x240   : > { %v827_v42 = vmul.f32 %v2286_v41, %v659_v14  ;;  %vm833_vm14 = vweird.f32 %v2286_v41 }
 0x241   : > { %2287 = vrsqrt.f32 %v3272_v50  ;;  %vm834_vm0 = vmor %vm832_vm15, %vm833_vm14  ;;  %vm842_vm4 = vweird.f32 %v3272_v50 }
 0x242   : > { %v828_v21 = vmul.f32 %v2286_v41, %v827_v42 }
 0x244   : > { %v829_v53 = vmul.f32 0.5, %v828_v21  ;;  %v428_v15 = vpop.xlane.xlu2 %427  ;;  %v587_v8 = vpop.xlane.xlu1 %586 }
 0x245   : > { %v475_v55 = vmul.f32 %v2742_v13, %v428_v15  ;;  %v583_v38 = vpop.xlane.xlu0 %582  ;;  %v631_v18 = vmul.f32 %v587_v8, %v2742_v13 }
 0x246   : > { %v830_v34 = vsub.f32 1.5, %v829_v53  ;;  %v629_v40 = vmul.f32 %v583_v38, %v2742_v13  ;;  %v1242_v48 = vpop.f32.mrf.mxu0 }
 0x247   : > { %v3284_v9 = vpop.eup %2287  ;;  %v3287_v61 = vsub.f32 %v3110_v20, %v475_v55  ;;  %v1331_v33 = vpop.f32.mrf.mxu1  ;;  %v3291_v7 = vadd.f32 1e-05, %v631_v18  ;;  %v1243_v24 = vadd.f32 %v1242_v48, %v3093_v32 }
 0x248   : > { %v831_v6 = vmul.f32 %v2286_v41, %v830_v34  ;;  %v837_v39 = vmul.f32 %v3284_v9, %v3272_v50  ;;  %v3293_v29 = vadd.f32 1e-05, %v629_v40  ;;  %v1332_v1 = vadd.f32 %v1331_v33, %v3120_v23  ;;  %v3353_v50 = vld [vmem:[%s2721_s9 + $0xf8] sm:$0xff] }
 0x249   : > { %v539_v57 = vmul.f32 %v3287_v61, %v3287_v61  ;;  %vm843_vm1 = vweird.f32 %v3284_v9  ;;  %v1408_v21 = vmax.f32 %v1243_v24, 0.0  ;;  %vm872_vm7 = vweird.f32 %v3291_v7 }
 0x24a   : > { %v838_v20 = vmul.f32 %v3284_v9, %v837_v39  ;;  %v835_v45 = vsel %vm834_vm0, %v2286_v41, %v831_v6  ;;  %2289 = vrsqrt.f32 %v3293_v29  ;;  %vm852_vm2 = vweird.f32 %v3293_v29  ;;  %vm3342_vm5 = vmor %vm842_vm4, %vm843_vm1 }
 0x24b   : > { %594 = vadd.xlane.f32.xlu0 %v539_v57  ;;  %2291 = vrsqrt.f32 %v3291_v7  ;;  %v1011_v49 = vmul.f32 %v835_v45, %v3031_v47 }
 0x24c   : > { %v839_v37 = vmul.f32 0.5, %v838_v20  ;;  %v430_v62 = vpop.xlane.xlu2 %429  ;;  %v589_v63 = vpop.xlane.xlu1 %588 }
 0x24d   : > { %v476_v58 = vmul.f32 %v2742_v13, %v430_v62  ;;  %v585_v30 = vpop.xlane.xlu0 %584  ;;  %v1047_v36 = vmul.f32 %v2877_v43, %v1011_v49  ;;  %v1409_v43 = vmax.f32 %v1332_v1, 0.0  ;;  %v632_v53 = vmul.f32 %v589_v63, %v2742_v13 }
 0x24e   : > { %v630_v31 = vmul.f32 %v585_v30, %v2742_v13  ;;  %v1244_v5 = vpop.f32.mrf.mxu0  ;;  %v840_v46 = vsub.f32 1.5, %v839_v37 }
 0x24f   : > { %v3308_v3 = vsub.f32 %v3153_v17, %v476_v58  ;;  %v1333_v14 = vpop.f32.mrf.mxu1  ;;  %v1245_v47 = vadd.f32 %v1244_v5, %v3093_v32  ;;  %v1083_v44 = vadd.f32 %v2894_v4, %v1047_v36  ;;  %v3366_v24 = vadd.f32 1e-05, %v632_v53 }
 0x250   : > { %v3310_v19 = vadd.f32 1e-05, %v630_v31  ;;  %v3314_v11 = vpop.eup %2289  ;;  %v1334_v41 = vadd.f32 %v1333_v14, %v3120_v23  ;;  %v841_v55 = vmul.f32 %v3284_v9, %v840_v46 }
 0x251   : > { %v540_v42 = vmul.f32 %v3308_v3, %v3308_v3  ;;  %v3320_v17 = vpop.eup %2291  ;;  %v847_v16 = vmul.f32 %v3314_v11, %v3293_v29  ;;  %v1410_v15 = vmax.f32 %v1245_v47, 0.0  ;;  %vm853_vm3 = vweird.f32 %v3314_v11 }
 0x252   : > { %2293 = vrsqrt.f32 %v3310_v19  ;;  %v1411_v38 = vmax.f32 %v1334_v41, 0.0  ;;  %v867_v18 = vmul.f32 %v3320_v17, %v3291_v7  ;;  %v1107_v57 = vpack.c.bf16 %v1083_v44, %v1082_v59  ;;  %vm3362_vm6 = vmor %vm852_vm2, %vm853_vm3 }
 0x253   : > { %596 = vadd.xlane.f32.xlu0 %v540_v42  ;;  %v848_v8 = vmul.f32 %v3314_v11, %v847_v16  ;;  %v1466_v6 = vpack.c.bf16 %v1410_v15, %v1408_v21  ;;  %v845_v29 = vsel %vm3342_vm5, %v3284_v9, %v841_v55  ;;  %vm873_vm8 = vweird.f32 %v3320_v17 }
 0x254   : > { %v591_v34 = vpop.xlane.xlu2 %590  ;;  %v436_v48 = vpop.xlane.xlu1 %435  ;;  %v1467_v45 = vpack.c.bf16 %v1411_v38, %v1409_v43  ;;  %1261 = vmatmul.bf16.gmra.mxu0 %v1107_v57  ;;  %1350 = vmatmul.bf16.gmra.mxu1 %v1107_v57  ;;  %v868_v30 = vmul.f32 %v3320_v17, %v867_v18  ;;  %v1012_v59 = vmul.f32 %v845_v29, %v3055_v51  ;;  %vm862_vm9 = vweird.f32 %v3310_v19  ;;  %vm3449_vm12 = vmor %vm872_vm7, %vm873_vm8 }
 0x255   : > { %v633_v40 = vmul.f32 %v591_v34, %v2742_v13  ;;  %v432_v33 = vpop.xlane.xlu0 %431  ;;  %v849_v39 = vmul.f32 0.5, %v848_v8  ;;  %v479_v10 = vmul.f32 %v2742_v13, %v436_v48  ;;  %1647 = vmatmul.bf16.gmra.mxu2 %v1466_v6  ;;  %v3410_v6 = vld [vmem:[#allocation5] ss:$0 sm:$0xff]  ;;  %vm882_vm13 = vweird.f32 %v3366_v24 }
 0x256   : > { %v477_v20 = vmul.f32 %v2742_v13, %v432_v33  ;;  %1736 = vmatmul.bf16.gmra.mxu3 %v1467_v45  ;;  %v869_v41 = vmul.f32 0.5, %v868_v30 }
 0x257   : > { %v3338_v4 = vadd.f32 1e-05, %v633_v40  ;;  %v850_v62 = vsub.f32 1.5, %v849_v39  ;;  %v3347_v49 = vsub.f32 %v3197_v56, %v479_v10 }
 0x258   : > { %v3350_v58 = vsub.f32 %v3192_v28, %v477_v20  ;;  %v3355_v63 = vpop.eup %2293  ;;  %v1247_v28 = vpop.f32.mrf.mxu0  ;;  %v870_v18 = vsub.f32 1.5, %v869_v41 }
 0x259   : > { %2295 = vrsqrt.f32 %v3338_v4  ;;  %v1336_v56 = vpop.f32.mrf.mxu1  ;;  %v851_v31 = vmul.f32 %v3314_v11, %v850_v62  ;;  %v857_v1 = vmul.f32 %v3355_v63, %v3310_v19  ;;  %v543_v5 = vmul.f32 %v3347_v49, %v3347_v49 }
 0x25a   : > { %v541_v46 = vmul.f32 %v3350_v58, %v3350_v58  ;;  %2297 = vrsqrt.f32 %v3366_v24  ;;  %v1248_v21 = vadd.f32 %v1247_v28, %v3093_v32  ;;  %v1337_v8 = vadd.f32 %v1336_v56, %v3120_v23 }
 0x25b   : > { %443 = vadd.xlane.f32.xlu0 %v3353_v50  ;;  %v858_v14 = vmul.f32 %v3355_v63, %v857_v1  ;;  %v855_v36 = vsel %vm3362_vm6, %v3314_v11, %v851_v31  ;;  %602 = vadd.xlane.f32.xlu2 %v543_v5  ;;  %v3398_v11 = vld [vmem:[%s3840_s6] ss:$0 sm:$0xff]  ;;  %vm863_vm10 = vweird.f32 %v3355_v63  ;;  %v871_v19 = vmul.f32 %v3320_v17, %v870_v18 }
 0x25c   : > { %v3381_v47 = vpop.xlane.xlu2 %592  ;;  %v438_v9 = vpop.xlane.xlu1 %437  ;;  %598 = vadd.xlane.f32.xlu1 %v541_v46  ;;  %v1013_v51 = vmul.f32 %v855_v36, %v3088_v12  ;;  %v1048_v12 = vmul.f32 %v3410_v6, %v1012_v59  ;;  %v1412_v57 = vmax.f32 %v1248_v21, 0.0  ;;  %v1413_v0 = vmax.f32 %v1337_v8, 0.0  ;;  %vm3430_vm11 = vmor %vm862_vm9, %vm863_vm10  ;;  %v3437_v5 = vld [vmem:[%s3836_s2] ss:$0 sm:$0xff] }
 0x25d   : > { %v434_v42 = vpop.xlane.xlu0 %433  ;;  %v859_v16 = vmul.f32 0.5, %v858_v14  ;;  %v480_v43 = vmul.f32 %v2742_v13, %v438_v9  ;;  %v2321_v21 = vld [vmem:[%s2721_s9] sm:$0xff]  ;;  %vm892_vm14 = vweird.f32 %v3338_v4 }
 0x25e   : > { %v478_v53 = vmul.f32 %v2742_v13, %v434_v42  ;;  %v1049_v37 = vmul.f32 %v3410_v6, %v1013_v51  ;;  %v1084_v14 = vadd.f32 %v3437_v5, %v1048_v12 }
 0x25f   : > { %v3391_v15 = vpop.eup %2295  ;;  %v860_v55 = vsub.f32 1.5, %v859_v16  ;;  %v3404_v38 = vsub.f32 %v3226_v60, %v480_v43  ;;  %v1633_v44 = vpop.f32.mrf.mxu2 }
 0x260   : > { %v1722_v34 = vpop.f32.mrf.mxu3  ;;  %v3408_v40 = vsub.f32 %v3220_v52, %v478_v53  ;;  %v1249_v48 = vpop.f32.mrf.mxu0  ;;  %v887_v39 = vmul.f32 %v3391_v15, %v3338_v4  ;;  %v1634_v45 = vadd.f32 %v3398_v11, %v1633_v44  ;;  %v1085_v46 = vadd.f32 %v3437_v5, %v1049_v37 }
 0x261   : > { %v1338_v33 = vpop.f32.mrf.mxu1  ;;  %v1250_v60 = vadd.f32 %v1249_v48, %v3093_v32  ;;  %v3417_v20 = vpop.eup %2297  ;;  %v544_v52 = vmul.f32 %v3404_v38, %v3404_v38  ;;  %v861_v30 = vmul.f32 %v3355_v63, %v860_v55  ;;  %vm893_vm15 = vweird.f32 %v3391_v15 }
 0x262   : > { %v1339_v10 = vadd.f32 %v1338_v33, %v3120_v23  ;;  %v542_v62 = vmul.f32 %v3408_v40, %v3408_v40  ;;  %v1723_v29 = vadd.f32 %v1722_v34, %v1634_v45  ;;  %v877_v41 = vmul.f32 %v3417_v20, %v3366_v24  ;;  %vm3498_vm1 = vmor %vm892_vm14, %vm893_vm15 }
 0x263   : > { %v1414_v28 = vmax.f32 %v1250_v60, 0.0  ;;  %604 = vadd.xlane.f32.xlu0 %v544_v52  ;;  %v888_v16 = vmul.f32 %v3391_v15, %v887_v39  ;;  %v1108_v53 = vpack.c.bf16 %v1085_v46, %v1084_v14  ;;  %v865_v44 = vsel %vm3430_vm11, %v3355_v63, %v861_v30  ;;  %v2322_v60 = vld [vmem:[%s2721_s9 + $0x8] sm:$0xff] }
 0x264   : > { %v1415_v56 = vmax.f32 %v1339_v10, 0.0  ;;  %v440_v31 = vpop.xlane.xlu2 %439  ;;  %600 = vadd.xlane.f32.xlu1 %v542_v62  ;;  %v1802_v43 = vadd.f32 %v2321_v21, %v1723_v29  ;;  %v878_v18 = vmul.f32 %v3417_v20, %v877_v41  ;;  %v875_v63 = vsel %vm3449_vm12, %v3320_v17, %v871_v19 }
 0x265   : > { %v481_v36 = vmul.f32 %v2742_v13, %v440_v31  ;;  %v1468_v9 = vpack.c.bf16 %v1414_v28, %v1412_v57  ;;  %1266 = vmatmul.bf16.gmra.mxu0 %v1108_v53  ;;  %1355 = vmatmul.bf16.gmra.mxu1 %v1108_v53  ;;  %v889_v33 = vmul.f32 0.5, %v888_v16  ;;  %v1014_v39 = vmul.f32 %v865_v44, %v3135_v54  ;;  %v2323_v53 = vld [vmem:[%s2721_s9 + $0x10] sm:$0xff] }
 0x266   : > { %v1469_v42 = vpack.c.bf16 %v1415_v56, %v1413_v0  ;;  %1834 = vst [vmem:[%s3463_s11] sm:$0xff] %v1802_v43  ;;  %v1015_v52 = vmul.f32 %v875_v63, %v3091_v25  ;;  %v879_v37 = vmul.f32 0.5, %v878_v18  ;;  %vm883_vm0 = vweird.f32 %v3417_v20 }
 0x267   : > { %v3456_v51 = vsub.f32 %v3251_v22, %v481_v36  ;;  %1652 = vmatmul.bf16.gmra.mxu2 %v1468_v9  ;;  %v1635_v55 = vpop.f32.mrf.mxu2  ;;  %v890_v62 = vsub.f32 1.5, %v889_v33  ;;  %v1050_v17 = vmul.f32 %v3410_v6, %v1014_v39  ;;  %vm3509_vm2 = vmor %vm882_vm13, %vm883_vm0 }
 0x268   : > { %v1724_v8 = vpop.f32.mrf.mxu3  ;;  %v1252_v7 = vpop.f32.mrf.mxu0  ;;  %v1636_v22 = vadd.f32 %v3398_v11, %v1635_v55  ;;  %1741 = vmatmul.bf16.gmra.mxu3 %v1469_v42  ;;  %v1051_v29 = vmul.f32 %v3410_v6, %v1015_v52  ;;  %v880_v14 = vsub.f32 1.5, %v879_v37 }
 0x269   : > { %v1341_v34 = vpop.f32.mrf.mxu1  ;;  %v545_v48 = vmul.f32 %v3456_v51, %v3456_v51  ;;  %v1253_v54 = vadd.f32 %v1252_v7, %v3093_v32  ;;  %v891_v19 = vmul.f32 %v3391_v15, %v890_v62  ;;  %v1086_v9 = vadd.f32 %v3437_v5, %v1050_v17 }
 0x26a   : > { %v1725_v12 = vadd.f32 %v1724_v8, %v1636_v22  ;;  %v1342_v0 = vadd.f32 %v1341_v34, %v3120_v23  ;;  %v1087_v8 = vadd.f32 %v3437_v5, %v1051_v29  ;;  %v881_v44 = vmul.f32 %v3417_v20, %v880_v14 }
 0x26b   : > { %v1416_v42 = vmax.f32 %v1253_v54, 0.0  ;;  %v895_v63 = vsel %vm3498_vm1, %v3391_v15, %v891_v19 }
 0x26c   : > { %v442_v57 = vpop.xlane.xlu2 %441  ;;  %v1803_v10 = vadd.f32 %v2322_v60, %v1725_v12  ;;  %606 = vadd.xlane.f32.xlu1 %v545_v48  ;;  %v1417_v59 = vmax.f32 %v1342_v0, 0.0  ;;  %v1109_v4 = vpack.c.bf16 %v1087_v8, %v1086_v9  ;;  %v885_v39 = vsel %vm3509_vm2, %v3417_v20, %v881_v44 }
 0x26d   : > { %v482_v45 = vmul.f32 %v2742_v13, %v442_v57  ;;  %v1017_v60 = vmul.f32 %v895_v63, %v3188_v26  ;;  %v1016_v52 = vmul.f32 %v885_v39, %v3138_v27  ;;  %v634_v8 = vmul.f32 %v3381_v47, %v2742_v13 }
 0x26e   : > { %1835 = vst [vmem:[%s3463_s11 + $0x8] sm:$0xff] %v1803_v10  ;;  %v2324_v10 = vld [vmem:[%s2721_s9 + $0x18] sm:$0xff] }
 0x26f   : > { %v3479_v30 = vsub.f32 %v3263_v2, %v482_v45  ;;  %v1638_v28 = vpop.f32.mrf.mxu2  ;;  %v1053_v15 = vmul.f32 %v3410_v6, %v1017_v60  ;;  %v1052_v26 = vmul.f32 %v3410_v6, %v1016_v52  ;;  %v666_v44 = vadd.f32 1e-05, %v634_v8 }
 0x270   : > { %v1727_v56 = vpop.f32.mrf.mxu3  ;;  %v1254_v25 = vpop.f32.mrf.mxu0  ;;  %v1639_v1 = vadd.f32 %v3398_v11, %v1638_v28 }
 0x271   : > { %v1343_v31 = vpop.f32.mrf.mxu1  ;;  %v546_v2 = vmul.f32 %v3479_v30, %v3479_v30  ;;  %v1255_v46 = vadd.f32 %v1254_v25, %v3093_v32  ;;  %v1088_v19 = vadd.f32 %v3437_v5, %v1052_v26  ;;  %2299 = vrsqrt.f32 %v666_v44 }
 0x272   : > { %v1344_v36 = vadd.f32 %v1343_v31, %v3120_v23  ;;  %v1728_v41 = vadd.f32 %v1727_v56, %v1639_v1  ;;  %v1089_v31 = vadd.f32 %v3437_v5, %v1053_v15  ;;  %vm902_vm3 = vweird.f32 %v666_v44 }
 0x273   : > { %608 = vadd.xlane.f32.xlu2 %v546_v2  ;;  %v1418_v16 = vmax.f32 %v1255_v46, 0.0  ;;  %v2325_v46 = vld [vmem:[%s2721_s9 + $0x20] sm:$0xff] }
 0x274   : > { %v1419_v21 = vmax.f32 %v1344_v36, 0.0  ;;  %v1804_v55 = vadd.f32 %v2323_v53, %v1728_v41  ;;  %v2326_v53 = vld [vmem:[%s2721_s9 + $0x28] sm:$0xff] }
 0x275   : > { %v1470_v7 = vpack.c.bf16 %v1418_v16, %v1416_v42  ;;  %1271 = vmatmul.bf16.gmra.mxu0 %v1109_v4  ;;  %1360 = vmatmul.bf16.gmra.mxu1 %v1109_v4  ;;  %v1110_v42 = vpack.c.bf16 %v1089_v31, %v1088_v19 }
 0x276   : > { %v1471_v34 = vpack.c.bf16 %v1419_v21, %v1417_v59  ;;  %1836 = vst [vmem:[%s3463_s11 + $0x10] sm:$0xff] %v1804_v55 }
 0x277   : > { %1657 = vmatmul.bf16.gmra.mxu2 %v1470_v7  ;;  %v1640_v18 = vpop.f32.mrf.mxu2  ;;  %v2300_v7 = vpop.eup %2299 }
 0x278   : > { %v1729_v48 = vpop.f32.mrf.mxu3  ;;  %v1257_v33 = vpop.f32.mrf.mxu0  ;;  %v1641_v24 = vadd.f32 %v3398_v11, %v1640_v18  ;;  %1746 = vmatmul.bf16.gmra.mxu3 %v1471_v34  ;;  %v897_v34 = vmul.f32 %v2300_v7, %v666_v44  ;;  %vm903_vm4 = vweird.f32 %v2300_v7 }
 0x279   : > { %v1346_v12 = vpop.f32.mrf.mxu1  ;;  %v1258_v37 = vadd.f32 %v1257_v33, %v3093_v32  ;;  %vm904_vm5 = vmor %vm902_vm3, %vm903_vm4 }
 0x27a   : > { %v1730_v57 = vadd.f32 %v1729_v48, %v1641_v24  ;;  %v1347_v62 = vadd.f32 %v1346_v12, %v3120_v23  ;;  %v898_v22 = vmul.f32 %v2300_v7, %v897_v34 }
 0x27b   : > { %v1420_v1 = vmax.f32 %v1258_v37, 0.0 }
 0x27c   : > { %v1805_v45 = vadd.f32 %v2324_v10, %v1730_v57  ;;  %v1421_v2 = vmax.f32 %v1347_v62, 0.0  ;;  %v899_v63 = vmul.f32 0.5, %v898_v22 }
 0x27e   : > { %1837 = vst [vmem:[%s3463_s11 + $0x18] sm:$0xff] %v1805_v45  ;;  %v900_v33 = vsub.f32 1.5, %v899_v63 }
 0x27f   : > { %v1643_v17 = vpop.f32.mrf.mxu2 }
 0x280   : > { %v1732_v54 = vpop.f32.mrf.mxu3  ;;  %v1259_v0 = vpop.f32.mrf.mxu0  ;;  %v1644_v20 = vadd.f32 %v3398_v11, %v1643_v17  ;;  %v901_v47 = vmul.f32 %v2300_v7, %v900_v33 }
 0x281   : > { %v1348_v28 = vpop.f32.mrf.mxu1  ;;  %v1260_v56 = vadd.f32 %v1259_v0, %v3093_v32 }
 0x282   : > { %v1349_v27 = vadd.f32 %v1348_v28, %v3120_v23  ;;  %v1733_v25 = vadd.f32 %v1732_v54, %v1644_v20  ;;  %v905_v15 = vsel %vm904_vm5, %v2300_v7, %v901_v47 }
 0x283   : > { %v1422_v29 = vmax.f32 %v1260_v56, 0.0  ;;  %v1018_v26 = vmul.f32 %v905_v15, %v3211_v35 }
 0x284   : > { %v1423_v14 = vmax.f32 %v1349_v27, 0.0  ;;  %v1806_v36 = vadd.f32 %v2325_v46, %v1733_v25 }
 0x285   : > { %v1472_v41 = vpack.c.bf16 %v1422_v29, %v1420_v1  ;;  %1276 = vmatmul.bf16.gmra.mxu0 %v1110_v42  ;;  %1365 = vmatmul.bf16.gmra.mxu1 %v1110_v42 }
 0x286   : > { %v1473_v9 = vpack.c.bf16 %v1423_v14, %v1421_v2  ;;  %1838 = vst [vmem:[%s3463_s11 + $0x20] sm:$0xff] %v1806_v36  ;;  %v1054_v36 = vmul.f32 %v3410_v6, %v1018_v26  ;;  %v2327_v26 = vld [vmem:[%s2721_s9 + $0x30] sm:$0xff] }
 0x287   : > { %1662 = vmatmul.bf16.gmra.mxu2 %v1472_v41  ;;  %v1645_v59 = vpop.f32.mrf.mxu2 }
 0x288   : > { %v1646_v16 = vadd.f32 %v3398_v11, %v1645_v59  ;;  %1751 = vmatmul.bf16.gmra.mxu3 %v1473_v9  ;;  %v1734_v21 = vpop.f32.mrf.mxu3 }
 0x28a   : > { %v1735_v43 = vadd.f32 %v1734_v21, %v1646_v16  ;;  %v1090_v16 = vadd.f32 %v3437_v5, %v1054_v36 }
 0x28c   : > { %v1807_v55 = vadd.f32 %v2326_v53, %v1735_v43 }
 0x28e   : > { %1839 = vst [vmem:[%s3463_s11 + $0x28] sm:$0xff] %v1807_v55 }
 0x2be   : > { %v595_v4 = vpop.xlane.xlu0 %594 }
 0x2bf   : > { %v635_v18 = vmul.f32 %v595_v4, %v2742_v13 }
 0x2c1   : > { %v667_v48 = vadd.f32 1e-05, %v635_v18 }
 0x2c3   : > { %2301 = vrsqrt.f32 %v667_v48  ;;  %vm912_vm7 = vweird.f32 %v667_v48 }
 0x2c6   : > { %v597_v12 = vpop.xlane.xlu0 %596 }
 0x2c7   : > { %v636_v24 = vmul.f32 %v597_v12, %v2742_v13 }
 0x2c9   : > { %v2302_v39 = vpop.eup %2301  ;;  %v3543_v57 = vadd.f32 1e-05, %v636_v24 }
 0x2ca   : > { %v907_v60 = vmul.f32 %v2302_v39, %v667_v48  ;;  %vm913_vm6 = vweird.f32 %v2302_v39 }
 0x2cb   : > { %2303 = vrsqrt.f32 %v3543_v57  ;;  %vm914_vm8 = vmor %vm912_vm7, %vm913_vm6  ;;  %vm922_vm10 = vweird.f32 %v3543_v57 }
 0x2cc   : > { %v908_v10 = vmul.f32 %v2302_v39, %v907_v60 }
 0x2ce   : > { %v909_v45 = vmul.f32 0.5, %v908_v10  ;;  %v444_v52 = vpop.xlane.xlu0 %443  ;;  %v603_v17 = vpop.xlane.xlu2 %602 }
 0x2cf   : > { %v483_v37 = vmul.f32 %v2742_v13, %v444_v52  ;;  %v639_v0 = vmul.f32 %v603_v17, %v2742_v13  ;;  %v599_v28 = vpop.xlane.xlu1 %598 }
 0x2d0   : > { %v910_v62 = vsub.f32 1.5, %v909_v45  ;;  %v637_v25 = vmul.f32 %v599_v28, %v2742_v13 }
 0x2d1   : > { %v3547_v54 = vpop.eup %2303  ;;  %v3551_v20 = vsub.f32 %v3353_v50, %v483_v37  ;;  %v3557_v31 = vadd.f32 1e-05, %v639_v0  ;;  %v1262_v35 = vpop.f32.mrf.mxu0 }
 0x2d2   : > { %v911_v56 = vmul.f32 %v2302_v39, %v910_v62  ;;  %v917_v27 = vmul.f32 %v3547_v54, %v3543_v57  ;;  %v3562_v29 = vadd.f32 1e-05, %v637_v25  ;;  %v1351_v14 = vpop.f32.mrf.mxu1  ;;  %v1263_v43 = vadd.f32 %v1262_v35, %v3093_v32 }
 0x2d3   : > { %v547_v1 = vmul.f32 %v3551_v20, %v3551_v20  ;;  %2305 = vrsqrt.f32 %v3557_v31  ;;  %vm923_vm9 = vweird.f32 %v3547_v54  ;;  %v1352_v18 = vadd.f32 %v1351_v14, %v3120_v23 }
 0x2d4   : > { %v918_v2 = vmul.f32 %v3547_v54, %v917_v27  ;;  %v915_v50 = vsel %vm914_vm8, %v2302_v39, %v911_v56  ;;  %2307 = vrsqrt.f32 %v3562_v29  ;;  %vm932_vm11 = vweird.f32 %v3562_v29  ;;  %vm3592_vm12 = vmor %vm922_vm10, %vm923_vm9 }
 0x2d5   : > { %610 = vadd.xlane.f32.xlu0 %v547_v1  ;;  %v1019_v46 = vmul.f32 %v915_v50, %v3287_v61  ;;  %v1424_v39 = vmax.f32 %v1263_v43, 0.0  ;;  %v1425_v62 = vmax.f32 %v1352_v18, 0.0  ;;  %vm952_vm1 = vweird.f32 %v3557_v31 }
 0x2d6   : > { %v919_v19 = vmul.f32 0.5, %v918_v2  ;;  %v605_v42 = vpop.xlane.xlu0 %604 }
 0x2d7   : > { %v1055_v41 = vmul.f32 %v3410_v6, %v1019_v46  ;;  %v601_v59 = vpop.xlane.xlu1 %600  ;;  %v640_v61 = vmul.f32 %v605_v42, %v2742_v13 }
 0x2d8   : > { %v920_v9 = vsub.f32 1.5, %v919_v19  ;;  %v638_v53 = vmul.f32 %v601_v59, %v2742_v13  ;;  %v1648_v55 = vpop.f32.mrf.mxu2 }
 0x2d9   : > { %v1091_v21 = vadd.f32 %v3437_v5, %v1055_v41  ;;  %v3574_v8 = vpop.eup %2305  ;;  %v1649_v44 = vadd.f32 %v3398_v11, %v1648_v55  ;;  %v1737_v63 = vpop.f32.mrf.mxu3  ;;  %v3588_v47 = vadd.f32 1e-05, %v640_v61  ;;  %v2328_v61 = vld [vmem:[%s2721_s9 + $0x38] sm:$0xff] }
 0x2da   : > { %v2308_v34 = vpop.eup %2307  ;;  %v921_v22 = vmul.f32 %v3547_v54, %v920_v9  ;;  %v947_v4 = vmul.f32 %v3574_v8, %v3557_v31  ;;  %v3582_v48 = vadd.f32 1e-05, %v638_v53  ;;  %v1264_v12 = vpop.f32.mrf.mxu0  ;;  %vm953_vm2 = vweird.f32 %v3574_v8 }
 0x2db   : > { %v1111_v7 = vpack.c.bf16 %v1091_v21, %v1090_v16  ;;  %v927_v33 = vmul.f32 %v2308_v34, %v3562_v29  ;;  %v1353_v24 = vpop.f32.mrf.mxu1  ;;  %v1265_v10 = vadd.f32 %v1264_v12, %v3093_v32  ;;  %v1738_v52 = vadd.f32 %v1737_v63, %v1649_v44  ;;  %vm3642_vm4 = vmor %vm952_vm1, %vm953_vm2 }
 0x2dc   : > { %2309 = vrsqrt.f32 %v3582_v48  ;;  %v1354_v45 = vadd.f32 %v1353_v24, %v3120_v23  ;;  %v925_v15 = vsel %vm3592_vm12, %v3547_v54, %v921_v22  ;;  %v948_v37 = vmul.f32 %v3574_v8, %v947_v4 }
 0x2dd   : > { %1281 = vmatmul.bf16.gmra.mxu0 %v1111_v7  ;;  %1370 = vmatmul.bf16.gmra.mxu1 %v1111_v7  ;;  %v928_v57 = vmul.f32 %v2308_v34, %v927_v33  ;;  %vm933_vm13 = vweird.f32 %v2308_v34  ;;  %v1426_v0 = vmax.f32 %v1265_v10, 0.0  ;;  %v1808_v56 = vadd.f32 %v2327_v26, %v1738_v52 }
 0x2de   : > { %v1427_v28 = vmax.f32 %v1354_v45, 0.0  ;;  %2311 = vrsqrt.f32 %v3588_v47  ;;  %v1020_v46 = vmul.f32 %v925_v15, %v3308_v3  ;;  %vm934_vm14 = vmor %vm932_vm11, %vm933_vm13  ;;  %v949_v41 = vmul.f32 0.5, %v948_v37 }
 0x2df   : > { %v929_v17 = vmul.f32 0.5, %v928_v57  ;;  %v607_v27 = vpop.xlane.xlu1 %606  ;;  %1840 = vst [vmem:[%s3463_s11 + $0x30] sm:$0xff] %v1808_v56  ;;  %v1474_v50 = vpack.c.bf16 %v1426_v0, %v1424_v39  ;;  %vm942_vm15 = vweird.f32 %v3582_v48  ;;  %vm962_vm7 = vweird.f32 %v3588_v47 }
 0x2e0   : > { %v641_v25 = vmul.f32 %v607_v27, %v2742_v13  ;;  %v1650_v1 = vpop.f32.mrf.mxu2  ;;  %v1475_v35 = vpack.c.bf16 %v1427_v28, %v1425_v62  ;;  %v1056_v44 = vmul.f32 %v3410_v6, %v1020_v46  ;;  %v950_v7 = vsub.f32 1.5, %v949_v41 }
 0x2e1   : > { %v930_v2 = vsub.f32 1.5, %v929_v17  ;;  %v1651_v54 = vadd.f32 %v3398_v11, %v1650_v1  ;;  %v1739_v19 = vpop.f32.mrf.mxu3  ;;  %1667 = vmatmul.bf16.gmra.mxu2 %v1474_v50 }
 0x2e2   : > { %v2310_v14 = vpop.eup %2309  ;;  %v3611_v36 = vadd.f32 1e-05, %v641_v25  ;;  %1756 = vmatmul.bf16.gmra.mxu3 %v1475_v35  ;;  %v1267_v16 = vpop.f32.mrf.mxu0  ;;  %v1092_v12 = vadd.f32 %v3437_v5, %v1056_v44  ;;  %v951_v39 = vmul.f32 %v3574_v8, %v950_v7  ;;  %v2329_v25 = vld [vmem:[%s2721_s9 + $0x40] sm:$0xff]  ;;  %v2330_v44 = vld [vmem:[%s2721_s9 + $0x48] sm:$0xff] }
 0x2e3   : > { %v931_v9 = vmul.f32 %v2308_v34, %v930_v2  ;;  %v937_v42 = vmul.f32 %v2310_v14, %v3582_v48  ;;  %v1740_v59 = vadd.f32 %v1739_v19, %v1651_v54  ;;  %v1356_v3 = vpop.f32.mrf.mxu1  ;;  %vm943_vm0 = vweird.f32 %v2310_v14 }
 0x2e4   : > { %2313 = vrsqrt.f32 %v3611_v36  ;;  %v3615_v29 = vpop.eup %2311  ;;  %vm3627_vm3 = vmor %vm942_vm15, %vm943_vm0  ;;  %v1268_v10 = vadd.f32 %v1267_v16, %v3093_v32  ;;  %v1357_v15 = vadd.f32 %v1356_v3, %v3120_v23  ;;  %v955_v2 = vsel %vm3642_vm4, %v3574_v8, %v951_v39 }
 0x2e5   : > { %v935_v21 = vsel %vm934_vm14, %v2308_v34, %v931_v9  ;;  %v938_v43 = vmul.f32 %v2310_v14, %v937_v42  ;;  %v1809_v55 = vadd.f32 %v2328_v61, %v1740_v59  ;;  %v957_v33 = vmul.f32 %v3615_v29, %v3588_v47 }
 0x2e6   : > { %v1021_v53 = vmul.f32 %v935_v21, %v3350_v58  ;;  %v1428_v50 = vmax.f32 %v1268_v10, 0.0  ;;  %v1023_v42 = vmul.f32 %v955_v2, %v3347_v49  ;;  %vm972_vm5 = vweird.f32 %v3611_v36 }
 0x2e7   : > { %v939_v22 = vmul.f32 0.5, %v938_v43  ;;  %1841 = vst [vmem:[%s3463_s11 + $0x38] sm:$0xff] %v1809_v55  ;;  %v958_v31 = vmul.f32 %v3615_v29, %v957_v33  ;;  %vm963_vm8 = vweird.f32 %v3615_v29 }
 0x2e8   : > { %v1057_v4 = vmul.f32 %v3410_v6, %v1021_v53  ;;  %vm3678_vm10 = vmor %vm962_vm7, %vm963_vm8 }
 0x2e9   : > { %v940_v34 = vsub.f32 1.5, %v939_v22  ;;  %v959_v59 = vmul.f32 0.5, %v958_v31  ;;  %v1059_v22 = vmul.f32 %v3410_v6, %v1023_v42 }
 0x2ea   : > { %v1653_v18 = vpop.f32.mrf.mxu2  ;;  %v3625_v63 = vpop.eup %2313  ;;  %v1093_v24 = vadd.f32 %v3437_v5, %v1057_v4 }
 0x2eb   : > { %v1654_v48 = vadd.f32 %v3398_v11, %v1653_v18  ;;  %v941_v60 = vmul.f32 %v2310_v14, %v940_v34  ;;  %v967_v57 = vmul.f32 %v3625_v63, %v3611_v36  ;;  %v1742_v45 = vpop.f32.mrf.mxu3  ;;  %v1269_v37 = vpop.f32.mrf.mxu0  ;;  %v960_v55 = vsub.f32 1.5, %v959_v59 }
 0x2ec   : > { %v1358_v62 = vpop.f32.mrf.mxu1  ;;  %v1112_v0 = vpack.c.bf16 %v1093_v24, %v1092_v12  ;;  %v1270_v56 = vadd.f32 %v1269_v37, %v3093_v32  ;;  %vm973_vm6 = vweird.f32 %v3625_v63  ;;  %v1095_v33 = vadd.f32 %v3437_v5, %v1059_v22 }
 0x2ed   : > { %v1743_v17 = vadd.f32 %v1742_v45, %v1654_v48  ;;  %v945_v28 = vsel %vm3627_vm3, %v2310_v14, %v941_v60  ;;  %v968_v26 = vmul.f32 %v3625_v63, %v967_v57  ;;  %v1359_v27 = vadd.f32 %v1358_v62, %v3120_v23  ;;  %vm3672_vm9 = vmor %vm972_vm5, %vm973_vm6  ;;  %v2331_v62 = vld [vmem:[%s2721_s9 + $0x50] sm:$0xff] }
 0x2ee   : > { %1286 = vmatmul.bf16.gmra.mxu0 %v1112_v0  ;;  %1375 = vmatmul.bf16.gmra.mxu1 %v1112_v0  ;;  %v1430_v35 = vmax.f32 %v1270_v56, 0.0  ;;  %v1022_v54 = vmul.f32 %v945_v28, %v3408_v40  ;;  %v1429_v14 = vmax.f32 %v1357_v15, 0.0  ;;  %v961_v18 = vmul.f32 %v3615_v29, %v960_v55  ;;  %v2333_v55 = vld [vmem:[%s2721_s9 + $0x60] sm:$0xff] }
 0x2ef   : > { %v1810_v1 = vadd.f32 %v2329_v25, %v1743_v17  ;;  %v1431_v46 = vmax.f32 %v1359_v27, 0.0  ;;  %v969_v19 = vmul.f32 0.5, %v968_v26 }
 0x2f0   : > { %v1476_v41 = vpack.c.bf16 %v1430_v35, %v1428_v50  ;;  %v1058_v53 = vmul.f32 %v3410_v6, %v1022_v54  ;;  %v965_v37 = vsel %vm3678_vm10, %v3615_v29, %v961_v18 }
 0x2f1   : > { %1842 = vst [vmem:[%s3463_s11 + $0x40] sm:$0xff] %v1810_v1  ;;  %v1477_v16 = vpack.c.bf16 %v1431_v46, %v1429_v14  ;;  %v970_v61 = vsub.f32 1.5, %v969_v19  ;;  %v1024_v1 = vmul.f32 %v965_v37, %v3404_v38  ;;  %v2332_v46 = vld [vmem:[%s2721_s9 + $0x58] sm:$0xff] }
 0x2f2   : > { %v1655_v9 = vpop.f32.mrf.mxu2  ;;  %1672 = vmatmul.bf16.gmra.mxu2 %v1476_v41  ;;  %v1094_v49 = vadd.f32 %v3437_v5, %v1058_v53 }
 0x2f3   : > { %v1656_v3 = vadd.f32 %v3398_v11, %v1655_v9  ;;  %v1744_v8 = vpop.f32.mrf.mxu3  ;;  %1761 = vmatmul.bf16.gmra.mxu3 %v1477_v16  ;;  %v1272_v21 = vpop.f32.mrf.mxu0  ;;  %v971_v4 = vmul.f32 %v3625_v63, %v970_v61 }
 0x2f4   : > { %v1361_v43 = vpop.f32.mrf.mxu1  ;;  %v1273_v48 = vadd.f32 %v1272_v21, %v3093_v32  ;;  %v1113_v10 = vpack.c.bf16 %v1095_v33, %v1094_v49 }
 0x2f5   : > { %v1745_v40 = vadd.f32 %v1744_v8, %v1656_v3  ;;  %v1362_v12 = vadd.f32 %v1361_v43, %v3120_v23  ;;  %v975_v45 = vsel %vm3672_vm9, %v3625_v63, %v971_v4 }
 0x2f6   : > { %v1432_v0 = vmax.f32 %v1273_v48, 0.0  ;;  %v1025_v31 = vmul.f32 %v975_v45, %v3456_v51  ;;  %v1060_v51 = vmul.f32 %v3410_v6, %v1024_v1  ;;  %v2334_v48 = vld [vmem:[%s2721_s9 + $0x68] sm:$0xff] }
 0x2f7   : > { %v1811_v7 = vadd.f32 %v2330_v44, %v1745_v40  ;;  %v1433_v28 = vmax.f32 %v1362_v12, 0.0 }
 0x2f8   : > { %v1061_v14 = vmul.f32 %v3410_v6, %v1025_v31  ;;  %v1096_v42 = vadd.f32 %v3437_v5, %v1060_v51 }
 0x2f9   : > { %1843 = vst [vmem:[%s3463_s11 + $0x48] sm:$0xff] %v1811_v7 }
 0x2fa   : > { %v1658_v34 = vpop.f32.mrf.mxu2  ;;  %v1097_v41 = vadd.f32 %v3437_v5, %v1061_v14 }
 0x2fb   : > { %v1659_v36 = vadd.f32 %v3398_v11, %v1658_v34  ;;  %v1747_v24 = vpop.f32.mrf.mxu3  ;;  %v1274_v39 = vpop.f32.mrf.mxu0 }
 0x2fc   : > { %v1363_v60 = vpop.f32.mrf.mxu1  ;;  %v1275_v52 = vadd.f32 %v1274_v39, %v3093_v32  ;;  %v1114_v40 = vpack.c.bf16 %v1097_v41, %v1096_v42 }
 0x2fd   : > { %v1748_v57 = vadd.f32 %v1747_v24, %v1659_v36  ;;  %v1364_v15 = vadd.f32 %v1363_v60, %v3120_v23  ;;  %v609_v24 = vpop.xlane.xlu2 %608 }
 0x2fe   : > { %1291 = vmatmul.bf16.gmra.mxu0 %v1113_v10  ;;  %1380 = vmatmul.bf16.gmra.mxu1 %v1113_v10  ;;  %v1434_v26 = vmax.f32 %v1275_v52, 0.0  ;;  %v642_v39 = vmul.f32 %v609_v24, %v2742_v13 }
 0x2ff   : > { %v1812_v17 = vadd.f32 %v2331_v62, %v1748_v57  ;;  %v1435_v56 = vmax.f32 %v1364_v15, 0.0 }
 0x300   : > { %v1478_v63 = vpack.c.bf16 %v1434_v26, %v1432_v0  ;;  %v674_v60 = vadd.f32 1e-05, %v642_v39 }
 0x301   : > { %1844 = vst [vmem:[%s3463_s11 + $0x50] sm:$0xff] %v1812_v17  ;;  %v1479_v27 = vpack.c.bf16 %v1435_v56, %v1433_v28 }
 0x302   : > { %v1660_v25 = vpop.f32.mrf.mxu2  ;;  %1677 = vmatmul.bf16.gmra.mxu2 %v1478_v63  ;;  %2315 = vrsqrt.f32 %v674_v60  ;;  %vm982_vm11 = vweird.f32 %v674_v60 }
 0x303   : > { %v1661_v29 = vadd.f32 %v3398_v11, %v1660_v25  ;;  %v1749_v2 = vpop.f32.mrf.mxu3  ;;  %1766 = vmatmul.bf16.gmra.mxu3 %v1479_v27  ;;  %v1277_v50 = vpop.f32.mrf.mxu0 }
 0x304   : > { %v1366_v35 = vpop.f32.mrf.mxu1  ;;  %v1278_v59 = vadd.f32 %v1277_v50, %v3093_v32 }
 0x305   : > { %v1750_v54 = vadd.f32 %v1749_v2, %v1661_v29  ;;  %v1367_v16 = vadd.f32 %v1366_v35, %v3120_v23 }
 0x306   : > { %v1436_v7 = vmax.f32 %v1278_v59, 0.0 }
 0x307   : > { %v1813_v19 = vadd.f32 %v2332_v46, %v1750_v54  ;;  %v1437_v22 = vmax.f32 %v1367_v16, 0.0 }
 0x308   : > { %v2316_v57 = vpop.eup %2315 }
 0x309   : > { %1845 = vst [vmem:[%s3463_s11 + $0x58] sm:$0xff] %v1813_v19  ;;  %v977_v10 = vmul.f32 %v2316_v57, %v674_v60  ;;  %vm983_vm12 = vweird.f32 %v2316_v57 }
 0x30a   : > { %v1663_v9 = vpop.f32.mrf.mxu2  ;;  %vm984_vm13 = vmor %vm982_vm11, %vm983_vm12 }
 0x30b   : > { %v1664_v38 = vadd.f32 %v3398_v11, %v1663_v9  ;;  %v1752_v3 = vpop.f32.mrf.mxu3  ;;  %v1279_v8 = vpop.f32.mrf.mxu0  ;;  %v978_v45 = vmul.f32 %v2316_v57, %v977_v10 }
 0x30c   : > { %v1368_v21 = vpop.f32.mrf.mxu1  ;;  %v1280_v53 = vadd.f32 %v1279_v8, %v3093_v32 }
 0x30d   : > { %v1753_v43 = vadd.f32 %v1752_v3, %v1664_v38  ;;  %v1369_v61 = vadd.f32 %v1368_v21, %v3120_v23  ;;  %v979_v62 = vmul.f32 0.5, %v978_v45 }
 0x30e   : > { %1296 = vmatmul.bf16.gmra.mxu0 %v1114_v40  ;;  %1385 = vmatmul.bf16.gmra.mxu1 %v1114_v40  ;;  %v1438_v49 = vmax.f32 %v1280_v53, 0.0 }
 0x30f   : > { %v1814_v44 = vadd.f32 %v2333_v55, %v1753_v43  ;;  %v1439_v4 = vmax.f32 %v1369_v61, 0.0  ;;  %v980_v17 = vsub.f32 1.5, %v979_v62 }
 0x310   : > { %v1480_v34 = vpack.c.bf16 %v1438_v49, %v1436_v7 }
 0x311   : > { %1846 = vst [vmem:[%s3463_s11 + $0x60] sm:$0xff] %v1814_v44  ;;  %v1481_v18 = vpack.c.bf16 %v1439_v4, %v1437_v22  ;;  %v981_v28 = vmul.f32 %v2316_v57, %v980_v17  ;;  %v2337_v17 = vld [vmem:[%s2721_s9 + $0x80] sm:$0xff] }
 0x312   : > { %v1665_v58 = vpop.f32.mrf.mxu2  ;;  %1682 = vmatmul.bf16.gmra.mxu2 %v1480_v34 }
 0x313   : > { %v1666_v36 = vadd.f32 %v3398_v11, %v1665_v58  ;;  %v1754_v33 = vpop.f32.mrf.mxu3  ;;  %1771 = vmatmul.bf16.gmra.mxu3 %v1481_v18  ;;  %v985_v31 = vsel %vm984_vm13, %v2316_v57, %v981_v28  ;;  %v2336_v58 = vld [vmem:[%s2721_s9 + $0x78] sm:$0xff] }
 0x314   : > { %v1026_v29 = vmul.f32 %v985_v31, %v3479_v30 }
 0x315   : > { %v1755_v47 = vadd.f32 %v1754_v33, %v1666_v36 }
 0x316   : > { %v1062_v35 = vmul.f32 %v3410_v6, %v1026_v29  ;;  %v2338_v29 = vld [vmem:[%s2721_s9 + $0x88] sm:$0xff] }
 0x317   : > { %v1815_v12 = vadd.f32 %v2334_v48, %v1755_v47 }
 0x318   : > { %v1098_v9 = vadd.f32 %v3437_v5, %v1062_v35 }
 0x319   : > { %1847 = vst [vmem:[%s3463_s11 + $0x68] sm:$0xff] %v1815_v12 }
 0x348   : > { %v611_v52 = vpop.xlane.xlu0 %610 }
 0x349   : > { %v643_v15 = vmul.f32 %v611_v52, %v2742_v13 }
 0x34b   : > { %v675_v37 = vadd.f32 1e-05, %v643_v15 }
 0x34d   : > { %2317 = vrsqrt.f32 %v675_v37  ;;  %vm992_vm15 = vweird.f32 %v675_v37 }
 0x353   : > { %v2318_v0 = vpop.eup %2317 }
 0x354   : > { %v987_v26 = vmul.f32 %v2318_v0, %v675_v37  ;;  %vm993_vm14 = vweird.f32 %v2318_v0 }
 0x355   : > { %vm994_vm0 = vmor %vm992_vm15, %vm993_vm14 }
 0x356   : > { %v988_v56 = vmul.f32 %v2318_v0, %v987_v26 }
 0x358   : > { %v989_v63 = vmul.f32 0.5, %v988_v56 }
 0x35a   : > { %v990_v27 = vsub.f32 1.5, %v989_v63  ;;  %v1282_v25 = vpop.f32.mrf.mxu0  ;;  %v1371_v1 = vpop.f32.mrf.mxu1 }
 0x35b   : > { %v1283_v54 = vadd.f32 %v1282_v25, %v3093_v32  ;;  %v1372_v14 = vadd.f32 %v1371_v1, %v3120_v23 }
 0x35c   : > { %v991_v13 = vmul.f32 %v2318_v0, %v990_v27 }
 0x35d   : > { %v1441_v42 = vmax.f32 %v1372_v14, 0.0 }
 0x35e   : > { %v995_v2 = vsel %vm994_vm0, %v2318_v0, %v991_v13 }
 0x35f   : > { %v1027_v50 = vmul.f32 %v995_v2, %v3551_v20  ;;  %v1440_v20 = vmax.f32 %v1283_v54, 0.0 }
 0x361   : > { %v1063_v46 = vmul.f32 %v3410_v6, %v1027_v50 }
 0x362   : > { %v1284_v19 = vpop.f32.mrf.mxu0  ;;  %v1373_v51 = vpop.f32.mrf.mxu1 }
 0x363   : > { %v1285_v41 = vadd.f32 %v1284_v19, %v3093_v32  ;;  %v1374_v30 = vadd.f32 %v1373_v51, %v3120_v23  ;;  %v1099_v38 = vadd.f32 %v3437_v5, %v1063_v46  ;;  %v2335_v5 = vld [vmem:[%s2721_s9 + $0x70] sm:$0xff] }
 0x364   : > { %v1668_v21 = vpop.f32.mrf.mxu2 }
 0x365   : > { %v1442_v59 = vmax.f32 %v1285_v41, 0.0  ;;  %v1443_v16 = vmax.f32 %v1374_v30, 0.0  ;;  %v1115_v3 = vpack.c.bf16 %v1099_v38, %v1098_v9  ;;  %v1757_v43 = vpop.f32.mrf.mxu3  ;;  %v1669_v40 = vadd.f32 %v3398_v11, %v1668_v21  ;;  %v3748_v41 = vld [vmem:[%s3840_s6] ss:$0 sm:$0xff] }
 0x367   : > { %1301 = vmatmul.bf16.gmra.mxu0 %v1115_v3  ;;  %1390 = vmatmul.bf16.gmra.mxu1 %v1115_v3  ;;  %v1482_v6 = vpack.c.bf16 %v1442_v59, %v1440_v20  ;;  %v1483_v8 = vpack.c.bf16 %v1443_v16, %v1441_v42  ;;  %v1758_v53 = vadd.f32 %v1757_v43, %v1669_v40  ;;  %v2340_v59 = vld [vmem:[%s2721_s9 + $0x90] sm:$0xff] }
 0x369   : > { %1687 = vmatmul.bf16.gmra.mxu2 %v1482_v6  ;;  %1776 = vmatmul.bf16.gmra.mxu3 %v1483_v8  ;;  %v1816_v61 = vadd.f32 %v2335_v5, %v1758_v53 }
 0x36b   : > { %v1287_v55 = vpop.f32.mrf.mxu0  ;;  %v1376_v44 = vpop.f32.mrf.mxu1  ;;  %1848 = vst [vmem:[%s3463_s11 + $0x70] sm:$0xff] %v1816_v61  ;;  %v2341_v61 = vld [vmem:[%s2721_s9 + $0x98] sm:$0xff] }
 0x36c   : > { %v1670_v7 = vpop.f32.mrf.mxu2  ;;  %v1288_v34 = vadd.f32 %v1287_v55, %v3093_v32  ;;  %v1377_v18 = vadd.f32 %v1376_v44, %v3120_v23 }
 0x36d   : > { %v1759_v22 = vpop.f32.mrf.mxu3  ;;  %v1671_v49 = vadd.f32 %v3398_v11, %v1670_v7 }
 0x36e   : > { %v1444_v24 = vmax.f32 %v1288_v34, 0.0  ;;  %v1445_v39 = vmax.f32 %v1377_v18, 0.0 }
 0x36f   : > { %v1760_v4 = vadd.f32 %v1759_v22, %v1671_v49 }
 0x371   : > { %v1817_v36 = vadd.f32 %v2336_v58, %v1760_v4 }
 0x373   : > { %v1289_v33 = vpop.f32.mrf.mxu0  ;;  %v1378_v47 = vpop.f32.mrf.mxu1  ;;  %1849 = vst [vmem:[%s3463_s11 + $0x78] sm:$0xff] %v1817_v36 }
 0x374   : > { %v1290_v48 = vadd.f32 %v1289_v33, %v3093_v32  ;;  %v1379_v12 = vadd.f32 %v1378_v47, %v3120_v23 }
 0x375   : > { %v1673_v10 = vpop.f32.mrf.mxu2 }
 0x376   : > { %v1446_v60 = vmax.f32 %v1290_v48, 0.0  ;;  %v1447_v57 = vmax.f32 %v1379_v12, 0.0  ;;  %v1674_v45 = vadd.f32 %v3398_v11, %v1673_v10  ;;  %v1762_v52 = vpop.f32.mrf.mxu3 }
 0x378   : > { %v1484_v15 = vpack.c.bf16 %v1446_v60, %v1444_v24  ;;  %v1485_v37 = vpack.c.bf16 %v1447_v57, %v1445_v39  ;;  %v1763_v62 = vadd.f32 %v1762_v52, %v1674_v45  ;;  %v2342_v39 = vld [vmem:[%s2721_s9 + $0xa0] sm:$0xff] }
 0x37a   : > { %1692 = vmatmul.bf16.gmra.mxu2 %v1484_v15  ;;  %1781 = vmatmul.bf16.gmra.mxu3 %v1485_v37  ;;  %v1818_v0 = vadd.f32 %v2337_v17, %v1763_v62  ;;  %v2343_v15 = vld [vmem:[%s2721_s9 + $0xa8] sm:$0xff] }
 0x37b   : > { %v1292_v28 = vpop.f32.mrf.mxu0  ;;  %v1381_v26 = vpop.f32.mrf.mxu1 }
 0x37c   : > { %1850 = vst [vmem:[%s3463_s11 + $0x80] sm:$0xff] %v1818_v0  ;;  %v1293_v25 = vadd.f32 %v1292_v28, %v3093_v32  ;;  %v1382_v1 = vadd.f32 %v1381_v26, %v3120_v23 }
 0x37d   : > { %v1675_v56 = vpop.f32.mrf.mxu2 }
 0x37e   : > { %v1676_v31 = vadd.f32 %v3398_v11, %v1675_v56  ;;  %v1764_v63 = vpop.f32.mrf.mxu3  ;;  %v1448_v14 = vmax.f32 %v1293_v25, 0.0  ;;  %v1449_v46 = vmax.f32 %v1382_v1, 0.0 }
 0x380   : > { %v1765_v27 = vadd.f32 %v1764_v63, %v1676_v31 }
 0x382   : > { %v1819_v13 = vadd.f32 %v2338_v29, %v1765_v27 }
 0x383   : > { %v1294_v2 = vpop.f32.mrf.mxu0  ;;  %v1383_v50 = vpop.f32.mrf.mxu1 }
 0x384   : > { %v1295_v35 = vadd.f32 %v1294_v2, %v3093_v32  ;;  %v1384_v54 = vadd.f32 %v1383_v50, %v3120_v23  ;;  %1851 = vst [vmem:[%s3463_s11 + $0x88] sm:$0xff] %v1819_v13 }
 0x385   : > { %v1678_v51 = vpop.f32.mrf.mxu2 }
 0x386   : > { %v1450_v11 = vmax.f32 %v1295_v35, 0.0  ;;  %v1451_v19 = vmax.f32 %v1384_v54, 0.0  ;;  %v1679_v30 = vadd.f32 %v3748_v41, %v1678_v51  ;;  %v1767_v9 = vpop.f32.mrf.mxu3 }
 0x388   : > { %v1486_v38 = vpack.c.bf16 %v1450_v11, %v1448_v14  ;;  %v1487_v20 = vpack.c.bf16 %v1451_v19, %v1449_v46  ;;  %v1768_v42 = vadd.f32 %v1767_v9, %v1679_v30  ;;  %v2344_v46 = vld [vmem:[%s2721_s9 + $0xb0] sm:$0xff]  ;;  %v2345_v30 = vld [vmem:[%s2721_s9 + $0xb8] sm:$0xff] }
 0x38a   : > { %1697 = vmatmul.bf16.gmra.mxu2 %v1486_v38  ;;  %1786 = vmatmul.bf16.gmra.mxu3 %v1487_v20  ;;  %v1820_v16 = vadd.f32 %v2340_v59, %v1768_v42 }
 0x38b   : > { %v1297_v3 = vpop.f32.mrf.mxu0  ;;  %v1386_v6 = vpop.f32.mrf.mxu1 }
 0x38c   : > { %1852 = vst [vmem:[%s3463_s11 + $0x90] sm:$0xff] %v1820_v16  ;;  %v1298_v53 = vadd.f32 %v1297_v3, %v3093_v32  ;;  %v1387_v5 = vadd.f32 %v1386_v6, %v3120_v23  ;;  %v2346_v16 = vld [vmem:[%s2721_s9 + $0xc0] sm:$0xff] }
 0x38d   : > { %v1680_v8 = vpop.f32.mrf.mxu2 }
 0x38e   : > { %v1681_v21 = vadd.f32 %v3748_v41, %v1680_v8  ;;  %v1769_v43 = vpop.f32.mrf.mxu3  ;;  %v1452_v4 = vmax.f32 %v1298_v53, 0.0  ;;  %v1453_v34 = vmax.f32 %v1387_v5, 0.0 }
 0x390   : > { %v1770_v40 = vadd.f32 %v1769_v43, %v1681_v21 }
 0x392   : > { %v1821_v55 = vadd.f32 %v2341_v61, %v1770_v40  ;;  %v2347_v40 = vld [vmem:[%s2721_s9 + $0xc8] sm:$0xff] }
 0x393   : > { %v1299_v44 = vpop.f32.mrf.mxu0  ;;  %v1388_v7 = vpop.f32.mrf.mxu1 }
 0x394   : > { %v1300_v22 = vadd.f32 %v1299_v44, %v3093_v32  ;;  %v1389_v49 = vadd.f32 %v1388_v7, %v3120_v23  ;;  %1853 = vst [vmem:[%s3463_s11 + $0x98] sm:$0xff] %v1821_v55  ;;  %v2348_v7 = vld [vmem:[%s2721_s9 + $0xd0] sm:$0xff] }
 0x395   : > { %v1683_v36 = vpop.f32.mrf.mxu2 }
 0x396   : > { %v1454_v18 = vmax.f32 %v1300_v22, 0.0  ;;  %v1455_v58 = vmax.f32 %v1389_v49, 0.0  ;;  %v1684_v33 = vadd.f32 %v3748_v41, %v1683_v36  ;;  %v1772_v47 = vpop.f32.mrf.mxu3 }
 0x398   : > { %v1488_v48 = vpack.c.bf16 %v1454_v18, %v1452_v4  ;;  %v1489_v12 = vpack.c.bf16 %v1455_v58, %v1453_v34  ;;  %v1773_v24 = vadd.f32 %v1772_v47, %v1684_v33  ;;  %v2349_v58 = vld [vmem:[%s2721_s9 + $0xd8] sm:$0xff] }
 0x39a   : > { %1702 = vmatmul.bf16.gmra.mxu2 %v1488_v48  ;;  %1791 = vmatmul.bf16.gmra.mxu3 %v1489_v12  ;;  %v1822_v60 = vadd.f32 %v2342_v39, %v1773_v24  ;;  %v2350_v24 = vld [vmem:[%s2721_s9 + $0xe0] sm:$0xff] }
 0x39c   : > { %1854 = vst [vmem:[%s3463_s11 + $0xa0] sm:$0xff] %v1822_v60 }
 0x39d   : > { %v1685_v57 = vpop.f32.mrf.mxu2 }
 0x39e   : > { %v1686_v10 = vadd.f32 %v3748_v41, %v1685_v57  ;;  %v1774_v45 = vpop.f32.mrf.mxu3 }
 0x3a0   : > { %v1775_v52 = vadd.f32 %v1774_v45, %v1686_v10 }
 0x3a2   : > { %v1823_v37 = vadd.f32 %v2343_v15, %v1775_v52  ;;  %v2351_v52 = vld [vmem:[%s2721_s9 + $0xe8] sm:$0xff] }
 0x3a4   : > { %1855 = vst [vmem:[%s3463_s11 + $0xa8] sm:$0xff] %v1823_v37 }
 0x3e4   : > { %v1302_v62 = vpop.f32.mrf.mxu0  ;;  %v1391_v17 = vpop.f32.mrf.mxu1 }
 0x3e5   : > { %v1303_v0 = vadd.f32 %v1302_v62, %v3093_v32  ;;  %v1392_v28 = vadd.f32 %v1391_v17, %v3120_v23 }
 0x3e7   : > { %v1456_v29 = vmax.f32 %v1303_v0, 0.0  ;;  %v1457_v13 = vmax.f32 %v1392_v28, 0.0  ;;  %v2352_v28 = vld [vmem:[%s2721_s9 + $0xf0] sm:$0xff] }
 0x3ec   : > { %v1304_v26 = vpop.f32.mrf.mxu0  ;;  %v1393_v56 = vpop.f32.mrf.mxu1 }
 0x3ed   : > { %v1305_v31 = vadd.f32 %v1304_v26, %v3093_v32  ;;  %v1394_v63 = vadd.f32 %v1393_v56, %v3120_v23  ;;  %v1688_v27 = vpop.f32.mrf.mxu2  ;;  %v1777_v25 = vpop.f32.mrf.mxu3 }
 0x3ee   : > { %v1689_v1 = vadd.f32 %v3748_v41, %v1688_v27 }
 0x3ef   : > { %v1458_v2 = vmax.f32 %v1305_v31, 0.0  ;;  %v1459_v50 = vmax.f32 %v1394_v63, 0.0 }
 0x3f0   : > { %v1778_v35 = vadd.f32 %v1777_v25, %v1689_v1  ;;  %v2353_v25 = vld [vmem:[%s2721_s9 + $0xf8] sm:$0xff] }
 0x3f1   : > { %v1490_v54 = vpack.c.bf16 %v1458_v2, %v1456_v29  ;;  %v1491_v14 = vpack.c.bf16 %v1459_v50, %v1457_v13 }
 0x3f2   : > { %v1824_v11 = vadd.f32 %v2344_v46, %v1778_v35 }
 0x3f3   : > { %1707 = vmatmul.bf16.gmra.mxu2 %v1490_v54  ;;  %1796 = vmatmul.bf16.gmra.mxu3 %v1491_v14 }
 0x3f4   : > { %1856 = vst [vmem:[%s3463_s11 + $0xb0] sm:$0xff] %v1824_v11 }
 0x3f5   : > { %v1690_v32 = vpop.f32.mrf.mxu2  ;;  %v1779_v23 = vpop.f32.mrf.mxu3 }
 0x3f6   : > { %v1691_v19 = vadd.f32 %v3748_v41, %v1690_v32 }
 0x3f8   : > { %v1780_v51 = vadd.f32 %v1779_v23, %v1691_v19 }
 0x3fa   : > { %v1825_v9 = vadd.f32 %v2345_v30, %v1780_v51 }
 0x3fc   : > { %1857 = vst [vmem:[%s3463_s11 + $0xb8] sm:$0xff] %v1825_v9 }
 0x3fd   : > { %v1693_v38 = vpop.f32.mrf.mxu2  ;;  %v1782_v20 = vpop.f32.mrf.mxu3 }
 0x3fe   : > { %v1694_v42 = vadd.f32 %v3748_v41, %v1693_v38 }
 0x400   : > { %v1783_v59 = vadd.f32 %v1782_v20, %v1694_v42 }
 0x402   : > { %v1826_v3 = vadd.f32 %v2346_v16, %v1783_v59 }
 0x404   : > { %1858 = vst [vmem:[%s3463_s11 + $0xc0] sm:$0xff] %v1826_v3 }
 0x405   : > { %v1695_v6 = vpop.f32.mrf.mxu2  ;;  %v1784_v8 = vpop.f32.mrf.mxu3 }
 0x406   : > { %v1696_v21 = vadd.f32 %v3748_v41, %v1695_v6 }
 0x408   : > { %v1785_v43 = vadd.f32 %v1784_v8, %v1696_v21 }
 0x40a   : > { %v1827_v53 = vadd.f32 %v2347_v40, %v1785_v43 }
 0x40c   : > { %1859 = vst [vmem:[%s3463_s11 + $0xc8] sm:$0xff] %v1827_v53 }
 0x40d   : > { %v1698_v5 = vpop.f32.mrf.mxu2  ;;  %v1787_v61 = vpop.f32.mrf.mxu3 }
 0x40e   : > { %v1699_v55 = vadd.f32 %v3748_v41, %v1698_v5 }
 0x410   : > { %v1788_v44 = vadd.f32 %v1787_v61, %v1699_v55 }
 0x412   : > { %v1828_v22 = vadd.f32 %v2348_v7, %v1788_v44 }
 0x414   : > { %1860 = vst [vmem:[%s3463_s11 + $0xd0] sm:$0xff] %v1828_v22 }
 0x415   : > { %v1700_v49 = vpop.f32.mrf.mxu2  ;;  %v1789_v4 = vpop.f32.mrf.mxu3 }
 0x416   : > { %v1701_v34 = vadd.f32 %v3748_v41, %v1700_v49 }
 0x418   : > { %v1790_v18 = vadd.f32 %v1789_v4, %v1701_v34 }
 0x41a   : > { %v1829_v36 = vadd.f32 %v2349_v58, %v1790_v18 }
 0x41c   : > { %1861 = vst [vmem:[%s3463_s11 + $0xd8] sm:$0xff] %v1829_v36 }
 0x41d   : > { %v1703_v33 = vpop.f32.mrf.mxu2  ;;  %v1792_v47 = vpop.f32.mrf.mxu3 }
 0x41e   : > { %v1704_v48 = vadd.f32 %v3748_v41, %v1703_v33 }
 0x420   : > { %v1793_v12 = vadd.f32 %v1792_v47, %v1704_v48 }
 0x422   : > { %v1830_v39 = vadd.f32 %v2350_v24, %v1793_v12 }
 0x424   : > { %1862 = vst [vmem:[%s3463_s11 + $0xe0] sm:$0xff] %v1830_v39 }
 0x425   : > { %v1705_v60 = vpop.f32.mrf.mxu2  ;;  %v1794_v10 = vpop.f32.mrf.mxu3 }
 0x426   : > { %v1706_v57 = vadd.f32 %v3748_v41, %v1705_v60 }
 0x428   : > { %v1795_v45 = vadd.f32 %v1794_v10, %v1706_v57 }
 0x42a   : > { %v1831_v15 = vadd.f32 %v2351_v52, %v1795_v45 }
 0x42c   : > { %1863 = vst [vmem:[%s3463_s11 + $0xe8] sm:$0xff] %v1831_v15 }
 0x476   : > { %v1708_v37 = vpop.f32.mrf.mxu2  ;;  %v1797_v62 = vpop.f32.mrf.mxu3 }
 0x477   : > { %v1709_v17 = vadd.f32 %v3748_v41, %v1708_v37 }
 0x479   : > { %v1798_v0 = vadd.f32 %v1797_v62, %v1709_v17 }
 0x47b   : > { %v1832_v26 = vadd.f32 %v2352_v28, %v1798_v0 }
 0x47d   : > { %1864 = vst [vmem:[%s3463_s11 + $0xf0] sm:$0xff] %v1832_v26 }
 0x47e   : > { %v1710_v56 = vpop.f32.mrf.mxu2  ;;  %v1799_v63 = vpop.f32.mrf.mxu3 }
 0x47f   : > { %v1711_v31 = vadd.f32 %v3748_v41, %v1710_v56 }
 0x481   : > { %v1800_v27 = vadd.f32 %v1799_v63, %v1711_v31 }
 0x483   : > { %v1833_v1 = vadd.f32 %v2353_v25, %v1800_v27 }
 0x485   : > { %1865 = vst [vmem:[%s3463_s11 + $0xf8] sm:$0xff] %v1833_v1 }
 0x486   : > { %2501 = shalt.err (!%p2498_p11)
}
 0x487   : > { %s2558_s29 = smov 128   ;;  %s2559_s9 = smov 8  }
 0x488   : > { %2180 = dma.vmem_to_hbm [thread:$0]  (%p2685_p3), %s1880_s21, 4096, %s1882_s13, %s1867_s28, %s2558_s29, %s2558_s29, %s2559_s9  }
 0x489 PF: > { %s1896_s11 = sand.u32 1, %s2536_s24   ;;  %p3900_p12 = scmp.ge.s32.totalorder %s2548_s27, 2 }
 0x48a   : > { %s1897_s22 = scalar_lea.sflag [#allocation4], %s1896_s11 }
 0x48b   : > { %p2197_p13 = pnand %p3900_p12, %p2635_p6 }
 0x48d   : > { %p2198_p0 = pneg %p2197_p13 }
 0x48f   : > { %2531 = dma.done.wait (%p2198_p0), %s1897_s22, 4096  }
 0x490   : > { %2533 = vsyncadd (%p2198_p0), %s1897_s22, 4294963200  ;;  %p22_p5 = scmp.ge.s32.totalorder %s2672_s15, 4   ;;  %s3901_s24 = smov %s2540_s25 }
 0x491   : > { %s3902_s25 = smov %s2544_s26  ;;  %s3903_s26 = smov %s2681_s19 }
 0x492   : > { %s3904_s27 = smov %s2672_s15  ;;  %24 = sbr.rel (!%p22_p5) target bundleno = 9 (0x9), region = 105 }
 0x497   :  { %1903 = vsyncpa [#allocation3], 1 }
 0x498   :  { %1905 = vsyncpa [#allocation3 + $0x1], 1 }
 0x499   :  { %1906 = vsyncpa [#allocation6], 1 }
 0x49a   :  { %1907 = vsyncpa [#allocation9], 1 }
 0x49b   :  { %1908 = vsyncpa [#allocation4], 1 }
 0x49c   :  { %1910 = vsyncpa [#allocation4 + $0x1], 1 }

</bundles_post_ra>
